<compile_context>
chip_gen: v6e
topology: v6e:2x2x1
jax: 0.10.0
libtpu: 0.0.40
codegen_flags: <defaults>
</compile_context>

<pallas_src>
import functools
import math

import jax
import jax.numpy as jnp
from jax.experimental import pallas as pl
from jax.experimental.pallas import tpu as pltpu

# ---------------- synthetic "BERT" config (small) ----------------
VOCAB = 100
HIDDEN = 32
N_LAYERS = 2
N_HEADS = 2
HEAD_DIM = HIDDEN // N_HEADS
INTERMEDIATE = 64
MAX_POS = 16
NUM_CLASSES = 3
LN_EPS = 1e-12
ATTN_SCALE = 1.0 / math.sqrt(HEAD_DIM)


# ---------------- in-kernel helpers (operate on VMEM-resident values) --------
def _layernorm(y, g, b):
    mu = jnp.mean(y, axis=-1, keepdims=True)
    var = jnp.mean((y - mu) * (y - mu), axis=-1, keepdims=True)
    return (y - mu) * jax.lax.rsqrt(var + LN_EPS) * g + b


# ---------------- the single fused Pallas kernel ----------------
def _fused_encoder_kernel(
    ids_ref, mask_ref,
    word_ref, pos_ref, type_ref,
    emb_g_ref, emb_b_ref,
    wqkv_ref, bqkv_ref, wo_ref, bo_ref, ln1_g_ref, ln1_b_ref,
    w1_ref, b1_ref, w2_ref, b2_ref, ln2_g_ref, ln2_b_ref,
    wp_ref, bp_ref, wfc_ref, bfc_ref,
    out_ref,
    *, batch, seq):
    bs = batch * seq

    # ---- embeddings, fused gather via one-hot matmul (MXU) ----
    ids = ids_ref[...]                                               # (B*S, 1) int32
    vocab_iota = jax.lax.broadcasted_iota(jnp.int32, (bs, VOCAB), 1)
    onehot = (vocab_iota == ids).astype(jnp.float32)                 # (B*S, VOCAB)
    tok = jnp.dot(onehot, word_ref[...], preferred_element_type=jnp.float32)
    pos_rows = pos_ref[:seq, :]                                      # (S, H) static slice
    pos = jnp.concatenate([pos_rows] * batch, axis=0)                # (B*S, H)
    # TODO(synk): token_type_ids are hard-coded to 0 (single-segment input).
    typ = type_ref[0:1, :]                                           # (1, H)
    h = _layernorm(tok + pos + typ, emb_g_ref[...], emb_b_ref[...])  # (B*S, H)

    # Additive attention mask built in-kernel: 0 where attended, -1e9 where pad.
    amask = jnp.where(mask_ref[...] > 0, 0.0, -1e9).astype(jnp.float32)  # (B, S)
    amask3 = amask[:, None, :]                                           # (B, 1, S)

    # Static unroll over layers; all weights stay resident in VMEM.
    for l in range(N_LAYERS):
        # Fused QKV projection: one (B*S, H) @ (H, 3H) matmul (lane width 96).
        qkv = jnp.dot(h, wqkv_ref[l], preferred_element_type=jnp.float32)
        qkv = qkv + bqkv_ref[l]                                      # (B*S, 3H)

        head_ctx = []
        for hd in range(N_HEADS):
            lo = hd * HEAD_DIM
            q = qkv[:, lo:lo + HEAD_DIM].reshape(batch, seq, HEAD_DIM)
            k = qkv[:, HIDDEN + lo:HIDDEN + lo + HEAD_DIM].reshape(batch, seq, HEAD_DIM)
            v = qkv[:, 2 * HIDDEN + lo:2 * HIDDEN + lo + HEAD_DIM].reshape(batch, seq, HEAD_DIM)
            # Batched QK^T without transposing k (NT contraction on last dims).
            # 1/sqrt(Dh) scale is pre-folded into the Q block of wqkv.
            s = jax.lax.dot_general(q, k, (((2,), (2,)), ((0,), (0,))),
                                    preferred_element_type=jnp.float32)   # (B, S, S)
            s = s + amask3
            s = s - jnp.max(s, axis=-1, keepdims=True)
            p = jnp.exp(s)
            p = p * pl.reciprocal(jnp.sum(p, axis=-1, keepdims=True), approx=True)
            ctx = jax.lax.dot_general(p, v, (((2,), (1,)), ((0,), (0,))),
                                      preferred_element_type=jnp.float32)  # (B, S, Dh)
            head_ctx.append(ctx.reshape(bs, HEAD_DIM))
        # Lane-dense assembly of the full context; values never leave vregs.
        ctx_full = jnp.concatenate(head_ctx, axis=-1)                # (B*S, H)

        attn_out = jnp.dot(ctx_full, wo_ref[l],
                           preferred_element_type=jnp.float32) + bo_ref[l]
        h = _layernorm(attn_out + h, ln1_g_ref[l], ln1_b_ref[l])

        ff = jax.nn.gelu(jnp.dot(h, w1_ref[l],
                                 preferred_element_type=jnp.float32) + b1_ref[l],
                         approximate=True)                           # tanh GELU -> EUP
        ff = jnp.dot(ff, w2_ref[l],
                     preferred_element_type=jnp.float32) + b2_ref[l]
        h = _layernorm(ff + h, ln2_g_ref[l], ln2_b_ref[l])

    # Pooler: tanh(CLS @ Wp + bp); classifier: pooled @ Wfc + bfc.
    cls = h.reshape(batch, seq, HIDDEN)[:, 0, :]                     # (B, H)
    pooled = jnp.tanh(jnp.dot(cls, wp_ref[...],
                              preferred_element_type=jnp.float32) + bp_ref[...])
    # TODO(synk): nn.Dropout(0.3) is training-only; treated as identity (eval).
    out_ref[...] = jnp.dot(pooled, wfc_ref[...],
                           preferred_element_type=jnp.float32) + bfc_ref[...]


def bangla_fused(input_ids, attention_mask, p, *, batch, seq):
    kernel = functools.partial(_fused_encoder_kernel, batch=batch, seq=seq)
    vmem = pl.BlockSpec(memory_space=pltpu.MemorySpace.VMEM)
    ids = input_ids.reshape(batch * seq, 1).astype(jnp.int32)
    mask = attention_mask.astype(jnp.int32)
    args = (ids, mask,
            p["word_emb"], p["pos_emb"], p["type_emb"],
            p["emb_ln_g"], p["emb_ln_b"],
            p["wqkv"], p["bqkv"], p["wo"], p["bo"], p["ln1_g"], p["ln1_b"],
            p["w1"], p["b1"], p["w2"], p["b2"], p["ln2_g"], p["ln2_b"],
            p["wp"], p["bp"], p["wfc"], p["bfc"])
    return pl.pallas_call(
        kernel,
        out_shape=jax.ShapeDtypeStruct((batch, NUM_CLASSES), jnp.float32),
        in_specs=[vmem] * len(args),
        out_specs=vmem,
    )(*args)


# ---------------- parameter init (deterministic, synthetic) ----------------
def init_params(key):
    keys = iter(jax.random.split(key, 64))

    def normal(shape):
        return jax.random.normal(next(keys), shape, jnp.float32) * 0.02

    params = {
        "word_emb": normal((VOCAB, HIDDEN)),
        "pos_emb": normal((MAX_POS, HIDDEN)),
        "type_emb": normal((2, HIDDEN)),
        "emb_ln_g": jnp.ones((1, HIDDEN), jnp.float32),
        "emb_ln_b": jnp.zeros((1, HIDDEN), jnp.float32),
        # Per-layer weights stacked on a leading layer axis; QKV fused.
        "wqkv": normal((N_LAYERS, HIDDEN, 3 * HIDDEN)),
        "bqkv": jnp.zeros((N_LAYERS, 1, 3 * HIDDEN), jnp.float32),
        "wo": normal((N_LAYERS, HIDDEN, HIDDEN)),
        "bo": jnp.zeros((N_LAYERS, 1, HIDDEN), jnp.float32),
        "ln1_g": jnp.ones((N_LAYERS, 1, HIDDEN), jnp.float32),
        "ln1_b": jnp.zeros((N_LAYERS, 1, HIDDEN), jnp.float32),
        "w1": normal((N_LAYERS, HIDDEN, INTERMEDIATE)),
        "b1": jnp.zeros((N_LAYERS, 1, INTERMEDIATE), jnp.float32),
        "w2": normal((N_LAYERS, INTERMEDIATE, HIDDEN)),
        "b2": jnp.zeros((N_LAYERS, 1, HIDDEN), jnp.float32),
        "ln2_g": jnp.ones((N_LAYERS, 1, HIDDEN), jnp.float32),
        "ln2_b": jnp.zeros((N_LAYERS, 1, HIDDEN), jnp.float32),
        "wp": normal((HIDDEN, HIDDEN)),          # BERT pooler
        "bp": jnp.zeros((1, HIDDEN), jnp.float32),
        "wfc": normal((HIDDEN, NUM_CLASSES)),    # self.fc
        "bfc": jnp.zeros((1, NUM_CLASSES), jnp.float32),
    }
    # One-time weight prep: fold 1/sqrt(head_dim) into the Q block of the
    # fused QKV projection (and its bias) so the kernel skips `s * scale`.
    params["wqkv"] = params["wqkv"].at[:, :, :HIDDEN].multiply(ATTN_SCALE)
    params["bqkv"] = params["bqkv"].at[:, :, :HIDDEN].multiply(ATTN_SCALE)
    return params


# ---------------- forward: everything (incl. embedding gather) fused ---------
def forward(params, input_ids, attention_mask):
    B, S = input_ids.shape
    return bangla_fused(input_ids, attention_mask, params, batch=B, seq=S)


if __name__ == "__main__":
    key = jax.random.PRNGKey(0)
    params = init_params(key)

    B, S = 2, 8
    input_ids = jax.random.randint(jax.random.fold_in(key, 123), (B, S), 0, VOCAB)
    attention_mask = jnp.array([[1] * S, [1] * (S - 2) + [0] * 2], dtype=jnp.int32)

    logits = jax.jit(forward)(params, input_ids, attention_mask)
    jax.block_until_ready(logits)
    assert logits.shape == (B, NUM_CLASSES), logits.shape
    assert logits.dtype == jnp.float32
    print("KERNEL_OK")
</pallas_src>

<mosaic_0001>
module attributes {stable_mosaic.version = 11 : i64} {
  func.func @_fused_encoder_kernel(%arg0: memref<16x1xi32, #tpu.memory_space<vmem>>, %arg1: memref<2x8xi32, #tpu.memory_space<vmem>>, %arg2: memref<100x32xf32, #tpu.memory_space<vmem>>, %arg3: memref<16x32xf32, #tpu.memory_space<vmem>>, %arg4: memref<2x32xf32, #tpu.memory_space<vmem>>, %arg5: memref<1x32xf32, #tpu.memory_space<vmem>>, %arg6: memref<1x32xf32, #tpu.memory_space<vmem>>, %arg7: memref<2x32x96xf32, #tpu.memory_space<vmem>>, %arg8: memref<2x1x96xf32, #tpu.memory_space<vmem>>, %arg9: memref<2x32x32xf32, #tpu.memory_space<vmem>>, %arg10: memref<2x1x32xf32, #tpu.memory_space<vmem>>, %arg11: memref<2x1x32xf32, #tpu.memory_space<vmem>>, %arg12: memref<2x1x32xf32, #tpu.memory_space<vmem>>, %arg13: memref<2x32x64xf32, #tpu.memory_space<vmem>>, %arg14: memref<2x1x64xf32, #tpu.memory_space<vmem>>, %arg15: memref<2x64x32xf32, #tpu.memory_space<vmem>>, %arg16: memref<2x1x32xf32, #tpu.memory_space<vmem>>, %arg17: memref<2x1x32xf32, #tpu.memory_space<vmem>>, %arg18: memref<2x1x32xf32, #tpu.memory_space<vmem>>, %arg19: memref<32x32xf32, #tpu.memory_space<vmem>>, %arg20: memref<1x32xf32, #tpu.memory_space<vmem>>, %arg21: memref<32x3xf32, #tpu.memory_space<vmem>>, %arg22: memref<1x3xf32, #tpu.memory_space<vmem>>, %arg23: memref<2x3xf32, #tpu.memory_space<vmem>>) attributes {dimension_semantics = [], scalar_prefetch = 0 : i64, scratch_operands = 0 : i64, tpu.core_type = #tpu.core_type<tc>} {
    %c0 = arith.constant 0 : index
    %c0_0 = arith.constant 0 : index
    %0 = vector.load %arg0[%c0, %c0_0] : memref<16x1xi32, #tpu.memory_space<vmem>>, vector<16x1xi32>
    %1 = tpu.iota {dimensions = array<i32: 1>} : vector<16x100xi32>
    %2 = vector.broadcast %0 : vector<16x1xi32> to vector<16x100xi32>
    %3 = arith.cmpi eq, %1, %2 : vector<16x100xi32>
    %4 = arith.extui %3 : vector<16x100xi1> to vector<16x100xi32>
    %5 = arith.sitofp %4 : vector<16x100xi32> to vector<16x100xf32>
    %c0_1 = arith.constant 0 : index
    %c0_2 = arith.constant 0 : index
    %6 = vector.load %arg2[%c0_1, %c0_2] : memref<100x32xf32, #tpu.memory_space<vmem>>, vector<100x32xf32>
    %cst = arith.constant dense<0.000000e+00> : vector<16x32xf32>
    %7 = tpu.matmul %5, %6, %cst {dimension_numbers = #tpu.dot_dimension_numbers<[1], [0], [0], [1], [0, 0, 1, 1], [], []>} : vector<16x100xf32>, vector<100x32xf32>, vector<16x32xf32> -> vector<16x32xf32>
    %c0_3 = arith.constant 0 : index
    %c0_4 = arith.constant 0 : index
    %8 = vector.load %arg3[%c0_3, %c0_4] : memref<16x32xf32, #tpu.memory_space<vmem>>, vector<8x32xf32>
    %9 = tpu.concatenate %8, %8 in 0 : vector<8x32xf32>, vector<8x32xf32> -> vector<16x32xf32>
    %c0_5 = arith.constant 0 : index
    %c0_6 = arith.constant 0 : index
    %10 = vector.load %arg4[%c0_5, %c0_6] : memref<2x32xf32, #tpu.memory_space<vmem>>, vector<1x32xf32>
    %11 = arith.addf %7, %9 : vector<16x32xf32>
    %12 = vector.broadcast %10 : vector<1x32xf32> to vector<16x32xf32>
    %13 = arith.addf %11, %12 : vector<16x32xf32>
    %c0_7 = arith.constant 0 : index
    %c0_8 = arith.constant 0 : index
    %14 = vector.load %arg5[%c0_7, %c0_8] : memref<1x32xf32, #tpu.memory_space<vmem>>, vector<1x32xf32>
    %c0_9 = arith.constant 0 : index
    %c0_10 = arith.constant 0 : index
    %15 = vector.load %arg6[%c0_9, %c0_10] : memref<1x32xf32, #tpu.memory_space<vmem>>, vector<1x32xf32>
    %cst_11 = arith.constant dense<0.000000e+00> : vector<16xf32>
    %16 = vector.multi_reduction <add>, %13, %cst_11 [1] : vector<16x32xf32> to vector<16xf32>
    %17 = vector.shape_cast %16 : vector<16xf32> to vector<16x1xf32>
    %cst_12 = arith.constant 3.200000e+01 : f32
    %18 = vector.broadcast %cst_12 : f32 to vector<16x1xf32>
    %19 = arith.divf %17, %18 : vector<16x1xf32>
    %20 = vector.broadcast %19 : vector<16x1xf32> to vector<16x32xf32>
    %21 = arith.subf %13, %20 : vector<16x32xf32>
    %22 = vector.broadcast %19 : vector<16x1xf32> to vector<16x32xf32>
    %23 = arith.subf %13, %22 : vector<16x32xf32>
    %24 = arith.mulf %21, %23 : vector<16x32xf32>
    %cst_13 = arith.constant dense<0.000000e+00> : vector<16xf32>
    %25 = vector.multi_reduction <add>, %24, %cst_13 [1] : vector<16x32xf32> to vector<16xf32>
    %26 = vector.shape_cast %25 : vector<16xf32> to vector<16x1xf32>
    %cst_14 = arith.constant 3.200000e+01 : f32
    %27 = vector.broadcast %cst_14 : f32 to vector<16x1xf32>
    %28 = arith.divf %26, %27 : vector<16x1xf32>
    %29 = vector.broadcast %19 : vector<16x1xf32> to vector<16x32xf32>
    %30 = arith.subf %13, %29 : vector<16x32xf32>
    %cst_15 = arith.constant 9.99999996E-13 : f32
    %31 = vector.broadcast %cst_15 : f32 to vector<16x1xf32>
    %32 = arith.addf %28, %31 : vector<16x1xf32>
    %33 = math.rsqrt %32 : vector<16x1xf32>
    %34 = vector.broadcast %33 : vector<16x1xf32> to vector<16x32xf32>
    %35 = arith.mulf %30, %34 : vector<16x32xf32>
    %36 = vector.broadcast %14 : vector<1x32xf32> to vector<16x32xf32>
    %37 = arith.mulf %35, %36 : vector<16x32xf32>
    %38 = vector.broadcast %15 : vector<1x32xf32> to vector<16x32xf32>
    %39 = arith.addf %37, %38 : vector<16x32xf32>
    %c0_16 = arith.constant 0 : index
    %c0_17 = arith.constant 0 : index
    %40 = vector.load %arg1[%c0_16, %c0_17] : memref<2x8xi32, #tpu.memory_space<vmem>>, vector<2x8xi32>
    %c0_i32 = arith.constant 0 : i32
    %41 = vector.broadcast %c0_i32 : i32 to vector<2x8xi32>
    %42 = arith.cmpi sgt, %40, %41 : vector<2x8xi32>
    %cst_18 = arith.constant 0.000000e+00 : f32
    %cst_19 = arith.constant -1.000000e+09 : f32
    %43 = vector.broadcast %cst_18 : f32 to vector<2x8xf32>
    %44 = vector.broadcast %cst_19 : f32 to vector<2x8xf32>
    %45 = arith.select %42, %43, %44 : vector<2x8xi1>, vector<2x8xf32>
    %46 = vector.shape_cast %45 : vector<2x8xf32> to vector<2x1x8xf32>
    %c0_20 = arith.constant 0 : index
    %c0_21 = arith.constant 0 : index
    %c0_22 = arith.constant 0 : index
    %47 = vector.load %arg7[%c0_20, %c0_21, %c0_22] : memref<2x32x96xf32, #tpu.memory_space<vmem>>, vector<1x32x96xf32>
    %48 = vector.shape_cast %47 : vector<1x32x96xf32> to vector<32x96xf32>
    %cst_23 = arith.constant dense<0.000000e+00> : vector<16x96xf32>
    %49 = tpu.matmul %39, %48, %cst_23 {dimension_numbers = #tpu.dot_dimension_numbers<[1], [0], [0], [1], [0, 0, 1, 1], [], []>} : vector<16x32xf32>, vector<32x96xf32>, vector<16x96xf32> -> vector<16x96xf32>
    %c0_24 = arith.constant 0 : index
    %c0_25 = arith.constant 0 : index
    %c0_26 = arith.constant 0 : index
    %50 = vector.load %arg8[%c0_24, %c0_25, %c0_26] : memref<2x1x96xf32, #tpu.memory_space<vmem>>, vector<1x1x96xf32>
    %51 = vector.shape_cast %50 : vector<1x1x96xf32> to vector<1x96xf32>
    %52 = vector.broadcast %51 : vector<1x96xf32> to vector<16x96xf32>
    %53 = arith.addf %49, %52 : vector<16x96xf32>
    %54 = vector.extract_strided_slice %53 {offsets = [0, 0], sizes = [16, 16], strides = [1, 1]} : vector<16x96xf32> to vector<16x16xf32>
    %55 = vector.shape_cast %54 : vector<16x16xf32> to vector<2x8x16xf32>
    %56 = vector.extract_strided_slice %53 {offsets = [0, 32], sizes = [16, 16], strides = [1, 1]} : vector<16x96xf32> to vector<16x16xf32>
    %57 = vector.shape_cast %56 : vector<16x16xf32> to vector<2x8x16xf32>
    %58 = vector.extract_strided_slice %53 {offsets = [0, 64], sizes = [16, 16], strides = [1, 1]} : vector<16x96xf32> to vector<16x16xf32>
    %59 = vector.shape_cast %58 : vector<16x16xf32> to vector<2x8x16xf32>
    %cst_27 = arith.constant dense<0.000000e+00> : vector<2x8x8xf32>
    %60 = tpu.matmul %55, %57, %cst_27 {dimension_numbers = #tpu.dot_dimension_numbers<[2], [2], [1], [1], [0, 0, 0, 1, 1, 1], [0], [0]>} : vector<2x8x16xf32>, vector<2x8x16xf32>, vector<2x8x8xf32> -> vector<2x8x8xf32>
    %61 = vector.broadcast %46 : vector<2x1x8xf32> to vector<2x8x8xf32>
    %62 = arith.addf %60, %61 : vector<2x8x8xf32>
    %cst_28 = arith.constant dense<0xFF800000> : vector<2x8xf32>
    %63 = vector.multi_reduction <maximumf>, %62, %cst_28 [2] : vector<2x8x8xf32> to vector<2x8xf32>
    %64 = vector.shape_cast %63 : vector<2x8xf32> to vector<2x8x1xf32>
    %65 = vector.broadcast %64 : vector<2x8x1xf32> to vector<2x8x8xf32>
    %66 = arith.subf %62, %65 : vector<2x8x8xf32>
    %67 = math.exp %66 : vector<2x8x8xf32>
    %cst_29 = arith.constant dense<0.000000e+00> : vector<2x8xf32>
    %68 = vector.multi_reduction <add>, %67, %cst_29 [2] : vector<2x8x8xf32> to vector<2x8xf32>
    %69 = vector.shape_cast %68 : vector<2x8xf32> to vector<2x8x1xf32>
    %70 = tpu.reciprocal %69 {approx = true} : vector<2x8x1xf32> -> vector<2x8x1xf32>
    %71 = vector.broadcast %70 : vector<2x8x1xf32> to vector<2x8x8xf32>
    %72 = arith.mulf %67, %71 : vector<2x8x8xf32>
    %cst_30 = arith.constant dense<0.000000e+00> : vector<2x8x16xf32>
    %73 = tpu.matmul %72, %59, %cst_30 {dimension_numbers = #tpu.dot_dimension_numbers<[2], [1], [1], [2], [0, 0, 0, 1, 1, 2], [0], [0]>} : vector<2x8x8xf32>, vector<2x8x16xf32>, vector<2x8x16xf32> -> vector<2x8x16xf32>
    %74 = vector.shape_cast %73 : vector<2x8x16xf32> to vector<16x16xf32>
    %75 = vector.extract_strided_slice %53 {offsets = [0, 16], sizes = [16, 16], strides = [1, 1]} : vector<16x96xf32> to vector<16x16xf32>
    %76 = vector.shape_cast %75 : vector<16x16xf32> to vector<2x8x16xf32>
    %77 = vector.extract_strided_slice %53 {offsets = [0, 48], sizes = [16, 16], strides = [1, 1]} : vector<16x96xf32> to vector<16x16xf32>
    %78 = vector.shape_cast %77 : vector<16x16xf32> to vector<2x8x16xf32>
    %79 = vector.extract_strided_slice %53 {offsets = [0, 80], sizes = [16, 16], strides = [1, 1]} : vector<16x96xf32> to vector<16x16xf32>
    %80 = vector.shape_cast %79 : vector<16x16xf32> to vector<2x8x16xf32>
    %cst_31 = arith.constant dense<0.000000e+00> : vector<2x8x8xf32>
    %81 = tpu.matmul %76, %78, %cst_31 {dimension_numbers = #tpu.dot_dimension_numbers<[2], [2], [1], [1], [0, 0, 0, 1, 1, 1], [0], [0]>} : vector<2x8x16xf32>, vector<2x8x16xf32>, vector<2x8x8xf32> -> vector<2x8x8xf32>
    %82 = vector.broadcast %46 : vector<2x1x8xf32> to vector<2x8x8xf32>
    %83 = arith.addf %81, %82 : vector<2x8x8xf32>
    %cst_32 = arith.constant dense<0xFF800000> : vector<2x8xf32>
    %84 = vector.multi_reduction <maximumf>, %83, %cst_32 [2] : vector<2x8x8xf32> to vector<2x8xf32>
    %85 = vector.shape_cast %84 : vector<2x8xf32> to vector<2x8x1xf32>
    %86 = vector.broadcast %85 : vector<2x8x1xf32> to vector<2x8x8xf32>
    %87 = arith.subf %83, %86 : vector<2x8x8xf32>
    %88 = math.exp %87 : vector<2x8x8xf32>
    %cst_33 = arith.constant dense<0.000000e+00> : vector<2x8xf32>
    %89 = vector.multi_reduction <add>, %88, %cst_33 [2] : vector<2x8x8xf32> to vector<2x8xf32>
    %90 = vector.shape_cast %89 : vector<2x8xf32> to vector<2x8x1xf32>
    %91 = tpu.reciprocal %90 {approx = true} : vector<2x8x1xf32> -> vector<2x8x1xf32>
    %92 = vector.broadcast %91 : vector<2x8x1xf32> to vector<2x8x8xf32>
    %93 = arith.mulf %88, %92 : vector<2x8x8xf32>
    %cst_34 = arith.constant dense<0.000000e+00> : vector<2x8x16xf32>
    %94 = tpu.matmul %93, %80, %cst_34 {dimension_numbers = #tpu.dot_dimension_numbers<[2], [1], [1], [2], [0, 0, 0, 1, 1, 2], [0], [0]>} : vector<2x8x8xf32>, vector<2x8x16xf32>, vector<2x8x16xf32> -> vector<2x8x16xf32>
    %95 = vector.shape_cast %94 : vector<2x8x16xf32> to vector<16x16xf32>
    %96 = tpu.concatenate %74, %95 in 1 : vector<16x16xf32>, vector<16x16xf32> -> vector<16x32xf32>
    %c0_35 = arith.constant 0 : index
    %c0_36 = arith.constant 0 : index
    %c0_37 = arith.constant 0 : index
    %97 = vector.load %arg9[%c0_35, %c0_36, %c0_37] : memref<2x32x32xf32, #tpu.memory_space<vmem>>, vector<1x32x32xf32>
    %98 = vector.shape_cast %97 : vector<1x32x32xf32> to vector<32x32xf32>
    %cst_38 = arith.constant dense<0.000000e+00> : vector<16x32xf32>
    %99 = tpu.matmul %96, %98, %cst_38 {dimension_numbers = #tpu.dot_dimension_numbers<[1], [0], [0], [1], [0, 0, 1, 1], [], []>} : vector<16x32xf32>, vector<32x32xf32>, vector<16x32xf32> -> vector<16x32xf32>
    %c0_39 = arith.constant 0 : index
    %c0_40 = arith.constant 0 : index
    %c0_41 = arith.constant 0 : index
    %100 = vector.load %arg10[%c0_39, %c0_40, %c0_41] : memref<2x1x32xf32, #tpu.memory_space<vmem>>, vector<1x1x32xf32>
    %101 = vector.shape_cast %100 : vector<1x1x32xf32> to vector<1x32xf32>
    %102 = vector.broadcast %101 : vector<1x32xf32> to vector<16x32xf32>
    %103 = arith.addf %99, %102 : vector<16x32xf32>
    %104 = arith.addf %103, %39 : vector<16x32xf32>
    %c0_42 = arith.constant 0 : index
    %c0_43 = arith.constant 0 : index
    %c0_44 = arith.constant 0 : index
    %105 = vector.load %arg11[%c0_42, %c0_43, %c0_44] : memref<2x1x32xf32, #tpu.memory_space<vmem>>, vector<1x1x32xf32>
    %106 = vector.shape_cast %105 : vector<1x1x32xf32> to vector<1x32xf32>
    %c0_45 = arith.constant 0 : index
    %c0_46 = arith.constant 0 : index
    %c0_47 = arith.constant 0 : index
    %107 = vector.load %arg12[%c0_45, %c0_46, %c0_47] : memref<2x1x32xf32, #tpu.memory_space<vmem>>, vector<1x1x32xf32>
    %108 = vector.shape_cast %107 : vector<1x1x32xf32> to vector<1x32xf32>
    %cst_48 = arith.constant dense<0.000000e+00> : vector<16xf32>
    %109 = vector.multi_reduction <add>, %104, %cst_48 [1] : vector<16x32xf32> to vector<16xf32>
    %110 = vector.shape_cast %109 : vector<16xf32> to vector<16x1xf32>
    %cst_49 = arith.constant 3.200000e+01 : f32
    %111 = vector.broadcast %cst_49 : f32 to vector<16x1xf32>
    %112 = arith.divf %110, %111 : vector<16x1xf32>
    %113 = vector.broadcast %112 : vector<16x1xf32> to vector<16x32xf32>
    %114 = arith.subf %104, %113 : vector<16x32xf32>
    %115 = vector.broadcast %112 : vector<16x1xf32> to vector<16x32xf32>
    %116 = arith.subf %104, %115 : vector<16x32xf32>
    %117 = arith.mulf %114, %116 : vector<16x32xf32>
    %cst_50 = arith.constant dense<0.000000e+00> : vector<16xf32>
    %118 = vector.multi_reduction <add>, %117, %cst_50 [1] : vector<16x32xf32> to vector<16xf32>
    %119 = vector.shape_cast %118 : vector<16xf32> to vector<16x1xf32>
    %cst_51 = arith.constant 3.200000e+01 : f32
    %120 = vector.broadcast %cst_51 : f32 to vector<16x1xf32>
    %121 = arith.divf %119, %120 : vector<16x1xf32>
    %122 = vector.broadcast %112 : vector<16x1xf32> to vector<16x32xf32>
    %123 = arith.subf %104, %122 : vector<16x32xf32>
    %cst_52 = arith.constant 9.99999996E-13 : f32
    %124 = vector.broadcast %cst_52 : f32 to vector<16x1xf32>
    %125 = arith.addf %121, %124 : vector<16x1xf32>
    %126 = math.rsqrt %125 : vector<16x1xf32>
    %127 = vector.broadcast %126 : vector<16x1xf32> to vector<16x32xf32>
    %128 = arith.mulf %123, %127 : vector<16x32xf32>
    %129 = vector.broadcast %106 : vector<1x32xf32> to vector<16x32xf32>
    %130 = arith.mulf %128, %129 : vector<16x32xf32>
    %131 = vector.broadcast %108 : vector<1x32xf32> to vector<16x32xf32>
    %132 = arith.addf %130, %131 : vector<16x32xf32>
    %c0_53 = arith.constant 0 : index
    %c0_54 = arith.constant 0 : index
    %c0_55 = arith.constant 0 : index
    %133 = vector.load %arg13[%c0_53, %c0_54, %c0_55] : memref<2x32x64xf32, #tpu.memory_space<vmem>>, vector<1x32x64xf32>
    %134 = vector.shape_cast %133 : vector<1x32x64xf32> to vector<32x64xf32>
    %cst_56 = arith.constant dense<0.000000e+00> : vector<16x64xf32>
    %135 = tpu.matmul %132, %134, %cst_56 {dimension_numbers = #tpu.dot_dimension_numbers<[1], [0], [0], [1], [0, 0, 1, 1], [], []>} : vector<16x32xf32>, vector<32x64xf32>, vector<16x64xf32> -> vector<16x64xf32>
    %c0_57 = arith.constant 0 : index
    %c0_58 = arith.constant 0 : index
    %c0_59 = arith.constant 0 : index
    %136 = vector.load %arg14[%c0_57, %c0_58, %c0_59] : memref<2x1x64xf32, #tpu.memory_space<vmem>>, vector<1x1x64xf32>
    %137 = vector.shape_cast %136 : vector<1x1x64xf32> to vector<1x64xf32>
    %138 = vector.broadcast %137 : vector<1x64xf32> to vector<16x64xf32>
    %139 = arith.addf %135, %138 : vector<16x64xf32>
    %140 = arith.mulf %139, %139 : vector<16x64xf32>
    %141 = arith.mulf %139, %140 : vector<16x64xf32>
    %cst_60 = arith.constant 4.471500e-02 : f32
    %142 = vector.broadcast %cst_60 : f32 to vector<16x64xf32>
    %143 = arith.mulf %142, %141 : vector<16x64xf32>
    %144 = arith.addf %139, %143 : vector<16x64xf32>
    %cst_61 = arith.constant 0.797884583 : f32
    %145 = vector.broadcast %cst_61 : f32 to vector<16x64xf32>
    %146 = arith.mulf %145, %144 : vector<16x64xf32>
    %147 = math.tanh %146 : vector<16x64xf32>
    %cst_62 = arith.constant 1.000000e+00 : f32
    %148 = vector.broadcast %cst_62 : f32 to vector<16x64xf32>
    %149 = arith.addf %148, %147 : vector<16x64xf32>
    %cst_63 = arith.constant 5.000000e-01 : f32
    %150 = vector.broadcast %cst_63 : f32 to vector<16x64xf32>
    %151 = arith.mulf %150, %149 : vector<16x64xf32>
    %152 = arith.mulf %139, %151 : vector<16x64xf32>
    %c0_64 = arith.constant 0 : index
    %c0_65 = arith.constant 0 : index
    %c0_66 = arith.constant 0 : index
    %153 = vector.load %arg15[%c0_64, %c0_65, %c0_66] : memref<2x64x32xf32, #tpu.memory_space<vmem>>, vector<1x64x32xf32>
    %154 = vector.shape_cast %153 : vector<1x64x32xf32> to vector<64x32xf32>
    %cst_67 = arith.constant dense<0.000000e+00> : vector<16x32xf32>
    %155 = tpu.matmul %152, %154, %cst_67 {dimension_numbers = #tpu.dot_dimension_numbers<[1], [0], [0], [1], [0, 0, 1, 1], [], []>} : vector<16x64xf32>, vector<64x32xf32>, vector<16x32xf32> -> vector<16x32xf32>
    %c0_68 = arith.constant 0 : index
    %c0_69 = arith.constant 0 : index
    %c0_70 = arith.constant 0 : index
    %156 = vector.load %arg16[%c0_68, %c0_69, %c0_70] : memref<2x1x32xf32, #tpu.memory_space<vmem>>, vector<1x1x32xf32>
    %157 = vector.shape_cast %156 : vector<1x1x32xf32> to vector<1x32xf32>
    %158 = vector.broadcast %157 : vector<1x32xf32> to vector<16x32xf32>
    %159 = arith.addf %155, %158 : vector<16x32xf32>
    %160 = arith.addf %159, %132 : vector<16x32xf32>
    %c0_71 = arith.constant 0 : index
    %c0_72 = arith.constant 0 : index
    %c0_73 = arith.constant 0 : index
    %161 = vector.load %arg17[%c0_71, %c0_72, %c0_73] : memref<2x1x32xf32, #tpu.memory_space<vmem>>, vector<1x1x32xf32>
    %162 = vector.shape_cast %161 : vector<1x1x32xf32> to vector<1x32xf32>
    %c0_74 = arith.constant 0 : index
    %c0_75 = arith.constant 0 : index
    %c0_76 = arith.constant 0 : index
    %163 = vector.load %arg18[%c0_74, %c0_75, %c0_76] : memref<2x1x32xf32, #tpu.memory_space<vmem>>, vector<1x1x32xf32>
    %164 = vector.shape_cast %163 : vector<1x1x32xf32> to vector<1x32xf32>
    %cst_77 = arith.constant dense<0.000000e+00> : vector<16xf32>
    %165 = vector.multi_reduction <add>, %160, %cst_77 [1] : vector<16x32xf32> to vector<16xf32>
    %166 = vector.shape_cast %165 : vector<16xf32> to vector<16x1xf32>
    %cst_78 = arith.constant 3.200000e+01 : f32
    %167 = vector.broadcast %cst_78 : f32 to vector<16x1xf32>
    %168 = arith.divf %166, %167 : vector<16x1xf32>
    %169 = vector.broadcast %168 : vector<16x1xf32> to vector<16x32xf32>
    %170 = arith.subf %160, %169 : vector<16x32xf32>
    %171 = vector.broadcast %168 : vector<16x1xf32> to vector<16x32xf32>
    %172 = arith.subf %160, %171 : vector<16x32xf32>
    %173 = arith.mulf %170, %172 : vector<16x32xf32>
    %cst_79 = arith.constant dense<0.000000e+00> : vector<16xf32>
    %174 = vector.multi_reduction <add>, %173, %cst_79 [1] : vector<16x32xf32> to vector<16xf32>
    %175 = vector.shape_cast %174 : vector<16xf32> to vector<16x1xf32>
    %cst_80 = arith.constant 3.200000e+01 : f32
    %176 = vector.broadcast %cst_80 : f32 to vector<16x1xf32>
    %177 = arith.divf %175, %176 : vector<16x1xf32>
    %178 = vector.broadcast %168 : vector<16x1xf32> to vector<16x32xf32>
    %179 = arith.subf %160, %178 : vector<16x32xf32>
    %cst_81 = arith.constant 9.99999996E-13 : f32
    %180 = vector.broadcast %cst_81 : f32 to vector<16x1xf32>
    %181 = arith.addf %177, %180 : vector<16x1xf32>
    %182 = math.rsqrt %181 : vector<16x1xf32>
    %183 = vector.broadcast %182 : vector<16x1xf32> to vector<16x32xf32>
    %184 = arith.mulf %179, %183 : vector<16x32xf32>
    %185 = vector.broadcast %162 : vector<1x32xf32> to vector<16x32xf32>
    %186 = arith.mulf %184, %185 : vector<16x32xf32>
    %187 = vector.broadcast %164 : vector<1x32xf32> to vector<16x32xf32>
    %188 = arith.addf %186, %187 : vector<16x32xf32>
    %c1 = arith.constant 1 : index
    %c0_82 = arith.constant 0 : index
    %c0_83 = arith.constant 0 : index
    %189 = vector.load %arg7[%c1, %c0_82, %c0_83] : memref<2x32x96xf32, #tpu.memory_space<vmem>>, vector<1x32x96xf32>
    %190 = vector.shape_cast %189 : vector<1x32x96xf32> to vector<32x96xf32>
    %cst_84 = arith.constant dense<0.000000e+00> : vector<16x96xf32>
    %191 = tpu.matmul %188, %190, %cst_84 {dimension_numbers = #tpu.dot_dimension_numbers<[1], [0], [0], [1], [0, 0, 1, 1], [], []>} : vector<16x32xf32>, vector<32x96xf32>, vector<16x96xf32> -> vector<16x96xf32>
    %c1_85 = arith.constant 1 : index
    %c0_86 = arith.constant 0 : index
    %c0_87 = arith.constant 0 : index
    %192 = vector.load %arg8[%c1_85, %c0_86, %c0_87] : memref<2x1x96xf32, #tpu.memory_space<vmem>>, vector<1x1x96xf32>
    %193 = vector.shape_cast %192 : vector<1x1x96xf32> to vector<1x96xf32>
    %194 = vector.broadcast %193 : vector<1x96xf32> to vector<16x96xf32>
    %195 = arith.addf %191, %194 : vector<16x96xf32>
    %196 = vector.extract_strided_slice %195 {offsets = [0, 0], sizes = [16, 16], strides = [1, 1]} : vector<16x96xf32> to vector<16x16xf32>
    %197 = vector.shape_cast %196 : vector<16x16xf32> to vector<2x8x16xf32>
    %198 = vector.extract_strided_slice %195 {offsets = [0, 32], sizes = [16, 16], strides = [1, 1]} : vector<16x96xf32> to vector<16x16xf32>
    %199 = vector.shape_cast %198 : vector<16x16xf32> to vector<2x8x16xf32>
    %200 = vector.extract_strided_slice %195 {offsets = [0, 64], sizes = [16, 16], strides = [1, 1]} : vector<16x96xf32> to vector<16x16xf32>
    %201 = vector.shape_cast %200 : vector<16x16xf32> to vector<2x8x16xf32>
    %cst_88 = arith.constant dense<0.000000e+00> : vector<2x8x8xf32>
    %202 = tpu.matmul %197, %199, %cst_88 {dimension_numbers = #tpu.dot_dimension_numbers<[2], [2], [1], [1], [0, 0, 0, 1, 1, 1], [0], [0]>} : vector<2x8x16xf32>, vector<2x8x16xf32>, vector<2x8x8xf32> -> vector<2x8x8xf32>
    %203 = vector.broadcast %46 : vector<2x1x8xf32> to vector<2x8x8xf32>
    %204 = arith.addf %202, %203 : vector<2x8x8xf32>
    %cst_89 = arith.constant dense<0xFF800000> : vector<2x8xf32>
    %205 = vector.multi_reduction <maximumf>, %204, %cst_89 [2] : vector<2x8x8xf32> to vector<2x8xf32>
    %206 = vector.shape_cast %205 : vector<2x8xf32> to vector<2x8x1xf32>
    %207 = vector.broadcast %206 : vector<2x8x1xf32> to vector<2x8x8xf32>
    %208 = arith.subf %204, %207 : vector<2x8x8xf32>
    %209 = math.exp %208 : vector<2x8x8xf32>
    %cst_90 = arith.constant dense<0.000000e+00> : vector<2x8xf32>
    %210 = vector.multi_reduction <add>, %209, %cst_90 [2] : vector<2x8x8xf32> to vector<2x8xf32>
    %211 = vector.shape_cast %210 : vector<2x8xf32> to vector<2x8x1xf32>
    %212 = tpu.reciprocal %211 {approx = true} : vector<2x8x1xf32> -> vector<2x8x1xf32>
    %213 = vector.broadcast %212 : vector<2x8x1xf32> to vector<2x8x8xf32>
    %214 = arith.mulf %209, %213 : vector<2x8x8xf32>
    %cst_91 = arith.constant dense<0.000000e+00> : vector<2x8x16xf32>
    %215 = tpu.matmul %214, %201, %cst_91 {dimension_numbers = #tpu.dot_dimension_numbers<[2], [1], [1], [2], [0, 0, 0, 1, 1, 2], [0], [0]>} : vector<2x8x8xf32>, vector<2x8x16xf32>, vector<2x8x16xf32> -> vector<2x8x16xf32>
    %216 = vector.shape_cast %215 : vector<2x8x16xf32> to vector<16x16xf32>
    %217 = vector.extract_strided_slice %195 {offsets = [0, 16], sizes = [16, 16], strides = [1, 1]} : vector<16x96xf32> to vector<16x16xf32>
    %218 = vector.shape_cast %217 : vector<16x16xf32> to vector<2x8x16xf32>
    %219 = vector.extract_strided_slice %195 {offsets = [0, 48], sizes = [16, 16], strides = [1, 1]} : vector<16x96xf32> to vector<16x16xf32>
    %220 = vector.shape_cast %219 : vector<16x16xf32> to vector<2x8x16xf32>
    %221 = vector.extract_strided_slice %195 {offsets = [0, 80], sizes = [16, 16], strides = [1, 1]} : vector<16x96xf32> to vector<16x16xf32>
    %222 = vector.shape_cast %221 : vector<16x16xf32> to vector<2x8x16xf32>
    %cst_92 = arith.constant dense<0.000000e+00> : vector<2x8x8xf32>
    %223 = tpu.matmul %218, %220, %cst_92 {dimension_numbers = #tpu.dot_dimension_numbers<[2], [2], [1], [1], [0, 0, 0, 1, 1, 1], [0], [0]>} : vector<2x8x16xf32>, vector<2x8x16xf32>, vector<2x8x8xf32> -> vector<2x8x8xf32>
    %224 = vector.broadcast %46 : vector<2x1x8xf32> to vector<2x8x8xf32>
    %225 = arith.addf %223, %224 : vector<2x8x8xf32>
    %cst_93 = arith.constant dense<0xFF800000> : vector<2x8xf32>
    %226 = vector.multi_reduction <maximumf>, %225, %cst_93 [2] : vector<2x8x8xf32> to vector<2x8xf32>
    %227 = vector.shape_cast %226 : vector<2x8xf32> to vector<2x8x1xf32>
    %228 = vector.broadcast %227 : vector<2x8x1xf32> to vector<2x8x8xf32>
    %229 = arith.subf %225, %228 : vector<2x8x8xf32>
    %230 = math.exp %229 : vector<2x8x8xf32>
    %cst_94 = arith.constant dense<0.000000e+00> : vector<2x8xf32>
    %231 = vector.multi_reduction <add>, %230, %cst_94 [2] : vector<2x8x8xf32> to vector<2x8xf32>
    %232 = vector.shape_cast %231 : vector<2x8xf32> to vector<2x8x1xf32>
    %233 = tpu.reciprocal %232 {approx = true} : vector<2x8x1xf32> -> vector<2x8x1xf32>
    %234 = vector.broadcast %233 : vector<2x8x1xf32> to vector<2x8x8xf32>
    %235 = arith.mulf %230, %234 : vector<2x8x8xf32>
    %cst_95 = arith.constant dense<0.000000e+00> : vector<2x8x16xf32>
    %236 = tpu.matmul %235, %222, %cst_95 {dimension_numbers = #tpu.dot_dimension_numbers<[2], [1], [1], [2], [0, 0, 0, 1, 1, 2], [0], [0]>} : vector<2x8x8xf32>, vector<2x8x16xf32>, vector<2x8x16xf32> -> vector<2x8x16xf32>
    %237 = vector.shape_cast %236 : vector<2x8x16xf32> to vector<16x16xf32>
    %238 = tpu.concatenate %216, %237 in 1 : vector<16x16xf32>, vector<16x16xf32> -> vector<16x32xf32>
    %c1_96 = arith.constant 1 : index
    %c0_97 = arith.constant 0 : index
    %c0_98 = arith.constant 0 : index
    %239 = vector.load %arg9[%c1_96, %c0_97, %c0_98] : memref<2x32x32xf32, #tpu.memory_space<vmem>>, vector<1x32x32xf32>
    %240 = vector.shape_cast %239 : vector<1x32x32xf32> to vector<32x32xf32>
    %cst_99 = arith.constant dense<0.000000e+00> : vector<16x32xf32>
    %241 = tpu.matmul %238, %240, %cst_99 {dimension_numbers = #tpu.dot_dimension_numbers<[1], [0], [0], [1], [0, 0, 1, 1], [], []>} : vector<16x32xf32>, vector<32x32xf32>, vector<16x32xf32> -> vector<16x32xf32>
    %c1_100 = arith.constant 1 : index
    %c0_101 = arith.constant 0 : index
    %c0_102 = arith.constant 0 : index
    %242 = vector.load %arg10[%c1_100, %c0_101, %c0_102] : memref<2x1x32xf32, #tpu.memory_space<vmem>>, vector<1x1x32xf32>
    %243 = vector.shape_cast %242 : vector<1x1x32xf32> to vector<1x32xf32>
    %244 = vector.broadcast %243 : vector<1x32xf32> to vector<16x32xf32>
    %245 = arith.addf %241, %244 : vector<16x32xf32>
    %246 = arith.addf %245, %188 : vector<16x32xf32>
    %c1_103 = arith.constant 1 : index
    %c0_104 = arith.constant 0 : index
    %c0_105 = arith.constant 0 : index
    %247 = vector.load %arg11[%c1_103, %c0_104, %c0_105] : memref<2x1x32xf32, #tpu.memory_space<vmem>>, vector<1x1x32xf32>
    %248 = vector.shape_cast %247 : vector<1x1x32xf32> to vector<1x32xf32>
    %c1_106 = arith.constant 1 : index
    %c0_107 = arith.constant 0 : index
    %c0_108 = arith.constant 0 : index
    %249 = vector.load %arg12[%c1_106, %c0_107, %c0_108] : memref<2x1x32xf32, #tpu.memory_space<vmem>>, vector<1x1x32xf32>
    %250 = vector.shape_cast %249 : vector<1x1x32xf32> to vector<1x32xf32>
    %cst_109 = arith.constant dense<0.000000e+00> : vector<16xf32>
    %251 = vector.multi_reduction <add>, %246, %cst_109 [1] : vector<16x32xf32> to vector<16xf32>
    %252 = vector.shape_cast %251 : vector<16xf32> to vector<16x1xf32>
    %cst_110 = arith.constant 3.200000e+01 : f32
    %253 = vector.broadcast %cst_110 : f32 to vector<16x1xf32>
    %254 = arith.divf %252, %253 : vector<16x1xf32>
    %255 = vector.broadcast %254 : vector<16x1xf32> to vector<16x32xf32>
    %256 = arith.subf %246, %255 : vector<16x32xf32>
    %257 = vector.broadcast %254 : vector<16x1xf32> to vector<16x32xf32>
    %258 = arith.subf %246, %257 : vector<16x32xf32>
    %259 = arith.mulf %256, %258 : vector<16x32xf32>
    %cst_111 = arith.constant dense<0.000000e+00> : vector<16xf32>
    %260 = vector.multi_reduction <add>, %259, %cst_111 [1] : vector<16x32xf32> to vector<16xf32>
    %261 = vector.shape_cast %260 : vector<16xf32> to vector<16x1xf32>
    %cst_112 = arith.constant 3.200000e+01 : f32
    %262 = vector.broadcast %cst_112 : f32 to vector<16x1xf32>
    %263 = arith.divf %261, %262 : vector<16x1xf32>
    %264 = vector.broadcast %254 : vector<16x1xf32> to vector<16x32xf32>
    %265 = arith.subf %246, %264 : vector<16x32xf32>
    %cst_113 = arith.constant 9.99999996E-13 : f32
    %266 = vector.broadcast %cst_113 : f32 to vector<16x1xf32>
    %267 = arith.addf %263, %266 : vector<16x1xf32>
    %268 = math.rsqrt %267 : vector<16x1xf32>
    %269 = vector.broadcast %268 : vector<16x1xf32> to vector<16x32xf32>
    %270 = arith.mulf %265, %269 : vector<16x32xf32>
    %271 = vector.broadcast %248 : vector<1x32xf32> to vector<16x32xf32>
    %272 = arith.mulf %270, %271 : vector<16x32xf32>
    %273 = vector.broadcast %250 : vector<1x32xf32> to vector<16x32xf32>
    %274 = arith.addf %272, %273 : vector<16x32xf32>
    %c1_114 = arith.constant 1 : index
    %c0_115 = arith.constant 0 : index
    %c0_116 = arith.constant 0 : index
    %275 = vector.load %arg13[%c1_114, %c0_115, %c0_116] : memref<2x32x64xf32, #tpu.memory_space<vmem>>, vector<1x32x64xf32>
    %276 = vector.shape_cast %275 : vector<1x32x64xf32> to vector<32x64xf32>
    %cst_117 = arith.constant dense<0.000000e+00> : vector<16x64xf32>
    %277 = tpu.matmul %274, %276, %cst_117 {dimension_numbers = #tpu.dot_dimension_numbers<[1], [0], [0], [1], [0, 0, 1, 1], [], []>} : vector<16x32xf32>, vector<32x64xf32>, vector<16x64xf32> -> vector<16x64xf32>
    %c1_118 = arith.constant 1 : index
    %c0_119 = arith.constant 0 : index
    %c0_120 = arith.constant 0 : index
    %278 = vector.load %arg14[%c1_118, %c0_119, %c0_120] : memref<2x1x64xf32, #tpu.memory_space<vmem>>, vector<1x1x64xf32>
    %279 = vector.shape_cast %278 : vector<1x1x64xf32> to vector<1x64xf32>
    %280 = vector.broadcast %279 : vector<1x64xf32> to vector<16x64xf32>
    %281 = arith.addf %277, %280 : vector<16x64xf32>
    %282 = arith.mulf %281, %281 : vector<16x64xf32>
    %283 = arith.mulf %281, %282 : vector<16x64xf32>
    %cst_121 = arith.constant 4.471500e-02 : f32
    %284 = vector.broadcast %cst_121 : f32 to vector<16x64xf32>
    %285 = arith.mulf %284, %283 : vector<16x64xf32>
    %286 = arith.addf %281, %285 : vector<16x64xf32>
    %cst_122 = arith.constant 0.797884583 : f32
    %287 = vector.broadcast %cst_122 : f32 to vector<16x64xf32>
    %288 = arith.mulf %287, %286 : vector<16x64xf32>
    %289 = math.tanh %288 : vector<16x64xf32>
    %cst_123 = arith.constant 1.000000e+00 : f32
    %290 = vector.broadcast %cst_123 : f32 to vector<16x64xf32>
    %291 = arith.addf %290, %289 : vector<16x64xf32>
    %cst_124 = arith.constant 5.000000e-01 : f32
    %292 = vector.broadcast %cst_124 : f32 to vector<16x64xf32>
    %293 = arith.mulf %292, %291 : vector<16x64xf32>
    %294 = arith.mulf %281, %293 : vector<16x64xf32>
    %c1_125 = arith.constant 1 : index
    %c0_126 = arith.constant 0 : index
    %c0_127 = arith.constant 0 : index
    %295 = vector.load %arg15[%c1_125, %c0_126, %c0_127] : memref<2x64x32xf32, #tpu.memory_space<vmem>>, vector<1x64x32xf32>
    %296 = vector.shape_cast %295 : vector<1x64x32xf32> to vector<64x32xf32>
    %cst_128 = arith.constant dense<0.000000e+00> : vector<16x32xf32>
    %297 = tpu.matmul %294, %296, %cst_128 {dimension_numbers = #tpu.dot_dimension_numbers<[1], [0], [0], [1], [0, 0, 1, 1], [], []>} : vector<16x64xf32>, vector<64x32xf32>, vector<16x32xf32> -> vector<16x32xf32>
    %c1_129 = arith.constant 1 : index
    %c0_130 = arith.constant 0 : index
    %c0_131 = arith.constant 0 : index
    %298 = vector.load %arg16[%c1_129, %c0_130, %c0_131] : memref<2x1x32xf32, #tpu.memory_space<vmem>>, vector<1x1x32xf32>
    %299 = vector.shape_cast %298 : vector<1x1x32xf32> to vector<1x32xf32>
    %300 = vector.broadcast %299 : vector<1x32xf32> to vector<16x32xf32>
    %301 = arith.addf %297, %300 : vector<16x32xf32>
    %302 = arith.addf %301, %274 : vector<16x32xf32>
    %c1_132 = arith.constant 1 : index
    %c0_133 = arith.constant 0 : index
    %c0_134 = arith.constant 0 : index
    %303 = vector.load %arg17[%c1_132, %c0_133, %c0_134] : memref<2x1x32xf32, #tpu.memory_space<vmem>>, vector<1x1x32xf32>
    %304 = vector.shape_cast %303 : vector<1x1x32xf32> to vector<1x32xf32>
    %c1_135 = arith.constant 1 : index
    %c0_136 = arith.constant 0 : index
    %c0_137 = arith.constant 0 : index
    %305 = vector.load %arg18[%c1_135, %c0_136, %c0_137] : memref<2x1x32xf32, #tpu.memory_space<vmem>>, vector<1x1x32xf32>
    %306 = vector.shape_cast %305 : vector<1x1x32xf32> to vector<1x32xf32>
    %cst_138 = arith.constant dense<0.000000e+00> : vector<16xf32>
    %307 = vector.multi_reduction <add>, %302, %cst_138 [1] : vector<16x32xf32> to vector<16xf32>
    %308 = vector.shape_cast %307 : vector<16xf32> to vector<16x1xf32>
    %cst_139 = arith.constant 3.200000e+01 : f32
    %309 = vector.broadcast %cst_139 : f32 to vector<16x1xf32>
    %310 = arith.divf %308, %309 : vector<16x1xf32>
    %311 = vector.broadcast %310 : vector<16x1xf32> to vector<16x32xf32>
    %312 = arith.subf %302, %311 : vector<16x32xf32>
    %313 = vector.broadcast %310 : vector<16x1xf32> to vector<16x32xf32>
    %314 = arith.subf %302, %313 : vector<16x32xf32>
    %315 = arith.mulf %312, %314 : vector<16x32xf32>
    %cst_140 = arith.constant dense<0.000000e+00> : vector<16xf32>
    %316 = vector.multi_reduction <add>, %315, %cst_140 [1] : vector<16x32xf32> to vector<16xf32>
    %317 = vector.shape_cast %316 : vector<16xf32> to vector<16x1xf32>
    %cst_141 = arith.constant 3.200000e+01 : f32
    %318 = vector.broadcast %cst_141 : f32 to vector<16x1xf32>
    %319 = arith.divf %317, %318 : vector<16x1xf32>
    %320 = vector.broadcast %310 : vector<16x1xf32> to vector<16x32xf32>
    %321 = arith.subf %302, %320 : vector<16x32xf32>
    %cst_142 = arith.constant 9.99999996E-13 : f32
    %322 = vector.broadcast %cst_142 : f32 to vector<16x1xf32>
    %323 = arith.addf %319, %322 : vector<16x1xf32>
    %324 = math.rsqrt %323 : vector<16x1xf32>
    %325 = vector.broadcast %324 : vector<16x1xf32> to vector<16x32xf32>
    %326 = arith.mulf %321, %325 : vector<16x32xf32>
    %327 = vector.broadcast %304 : vector<1x32xf32> to vector<16x32xf32>
    %328 = arith.mulf %326, %327 : vector<16x32xf32>
    %329 = vector.broadcast %306 : vector<1x32xf32> to vector<16x32xf32>
    %330 = arith.addf %328, %329 : vector<16x32xf32>
    %331 = vector.shape_cast %330 : vector<16x32xf32> to vector<2x8x32xf32>
    %332 = vector.extract_strided_slice %331 {offsets = [0, 0, 0], sizes = [2, 1, 32], strides = [1, 1, 1]} : vector<2x8x32xf32> to vector<2x1x32xf32>
    %333 = vector.shape_cast %332 : vector<2x1x32xf32> to vector<2x32xf32>
    %c0_143 = arith.constant 0 : index
    %c0_144 = arith.constant 0 : index
    %334 = vector.load %arg19[%c0_143, %c0_144] : memref<32x32xf32, #tpu.memory_space<vmem>>, vector<32x32xf32>
    %cst_145 = arith.constant dense<0.000000e+00> : vector<2x32xf32>
    %335 = tpu.matmul %333, %334, %cst_145 {dimension_numbers = #tpu.dot_dimension_numbers<[1], [0], [0], [1], [0, 0, 1, 1], [], []>} : vector<2x32xf32>, vector<32x32xf32>, vector<2x32xf32> -> vector<2x32xf32>
    %c0_146 = arith.constant 0 : index
    %c0_147 = arith.constant 0 : index
    %336 = vector.load %arg20[%c0_146, %c0_147] : memref<1x32xf32, #tpu.memory_space<vmem>>, vector<1x32xf32>
    %337 = vector.broadcast %336 : vector<1x32xf32> to vector<2x32xf32>
    %338 = arith.addf %335, %337 : vector<2x32xf32>
    %339 = math.tanh %338 : vector<2x32xf32>
    %c0_148 = arith.constant 0 : index
    %c0_149 = arith.constant 0 : index
    %340 = vector.load %arg21[%c0_148, %c0_149] : memref<32x3xf32, #tpu.memory_space<vmem>>, vector<32x3xf32>
    %cst_150 = arith.constant dense<0.000000e+00> : vector<2x3xf32>
    %341 = tpu.matmul %339, %340, %cst_150 {dimension_numbers = #tpu.dot_dimension_numbers<[1], [0], [0], [1], [0, 0, 1, 1], [], []>} : vector<2x32xf32>, vector<32x3xf32>, vector<2x3xf32> -> vector<2x3xf32>
    %c0_151 = arith.constant 0 : index
    %c0_152 = arith.constant 0 : index
    %342 = vector.load %arg22[%c0_151, %c0_152] : memref<1x3xf32, #tpu.memory_space<vmem>>, vector<1x3xf32>
    %343 = vector.broadcast %342 : vector<1x3xf32> to vector<2x3xf32>
    %344 = arith.addf %341, %343 : vector<2x3xf32>
    %c0_153 = arith.constant 0 : index
    %c0_154 = arith.constant 0 : index
    %345 = vector.load %arg23[%c0_153, %c0_154] : memref<2x3xf32, #tpu.memory_space<vmem>>, vector<2x3xf32>
    tpu.vector_store %arg23[%c0_153, %c0_154], %344 {strides = array<i32>} : memref<2x3xf32, #tpu.memory_space<vmem>>, vector<2x3xf32>,
    return
  }
}

</mosaic_0001>

<bundles_post_ra>
// kernel: forward.1
= control target key start
LH: loop header
LB: loop body
LE: loop exit
PB: predicated region body
PF: predicated region fallthrough
CT: control target
= control target key end

     0   :  { %s3965_s0 = inlined_call_operand.vmem [shape: s32[16,1], index: 0, kind: input, shape index: {}]   ;;  %s3966_s1 = inlined_call_operand.vmem [shape: s32[2,8], index: 1, kind: input, shape index: {}]   ;;  %s3967_s2 = inlined_call_operand.vmem [shape: f32[100,32], index: 2, kind: input, shape index: {}]   ;;  %s3968_s3 = inlined_call_operand.vmem [shape: f32[16,32], index: 3, kind: input, shape index: {}]   ;;  %s3969_s4 = inlined_call_operand.vmem [shape: f32[2,32], index: 4, kind: input, shape index: {}]   ;;  %s3970_s5 = inlined_call_operand.vmem [shape: f32[1,32], index: 5, kind: input, shape index: {}]   ;;  %s3971_s6 = inlined_call_operand.vmem [shape: f32[1,32], index: 6, kind: input, shape index: {}]   ;;  %s3972_s7 = inlined_call_operand.vmem [shape: f32[2,32,96], index: 7, kind: input, shape index: {}]   ;;  %s3973_s8 = inlined_call_operand.vmem [shape: f32[2,1,96], index: 8, kind: input, shape index: {}]   ;;  %s3974_s9 = inlined_call_operand.vmem [shape: f32[2,32,32], index: 9, kind: input, shape index: {}]   ;;  %s3975_s10 = inlined_call_operand.vmem [shape: f32[2,1,32], index: 10, kind: input, shape index: {}]   ;;  %s3976_s11 = inlined_call_operand.vmem [shape: f32[2,1,32], index: 11, kind: input, shape index: {}]   ;;  %s3977_s12 = inlined_call_operand.vmem [shape: f32[2,1,32], index: 12, kind: input, shape index: {}]   ;;  %s3978_s13 = inlined_call_operand.vmem [shape: f32[2,32,64], index: 13, kind: input, shape index: {}]   ;;  %s3979_s14 = inlined_call_operand.vmem [shape: f32[2,1,64], index: 14, kind: input, shape index: {}]   ;;  %s3980_s15 = inlined_call_operand.vmem [shape: f32[2,64,32], index: 15, kind: input, shape index: {}]   ;;  %s3981_s16 = inlined_call_operand.vmem [shape: f32[2,1,32], index: 16, kind: input, shape index: {}]   ;;  %s3982_s17 = inlined_call_operand.vmem [shape: f32[2,1,32], index: 17, kind: input, shape index: {}]   ;;  %s3983_s18 = inlined_call_operand.vmem [shape: f32[2,1,32], index: 18, kind: input, shape index: {}]   ;;  %s3984_s19 = inlined_call_operand.vmem [shape: f32[32,32], index: 19, kind: input, shape index: {}]   ;;  %s3985_s20 = inlined_call_operand.vmem [shape: f32[1,32], index: 20, kind: input, shape index: {}]   ;;  %s3986_s21 = inlined_call_operand.vmem [shape: f32[32,3], index: 21, kind: input, shape index: {}]   ;;  %s3987_s22 = inlined_call_operand.vmem [shape: f32[1,3], index: 22, kind: input, shape index: {}]   ;;  %s3988_s23 = inlined_call_operand.hbm [shape: f32[2,3], index: 23, kind: output, shape index: {}]  }
   0x1   :  { %3993 = sst [smem:[#allocation5_spill]] %s3965_s0 }
   0x2   :  { %3994 = sst [smem:[#allocation6_spill]] %s3966_s1 }
   0x3   :  { %3995 = sst [smem:[#allocation7_spill]] %s3967_s2 }
   0x4   :  { %3996 = sst [smem:[#allocation8_spill]] %s3968_s3 }
   0x5   :  { %3997 = sst [smem:[#allocation9_spill]] %s3969_s4 }
   0x6   :  { %3998 = sst [smem:[#allocation10_spill]] %s3970_s5 }
   0x7   :  { %3999 = sst [smem:[#allocation11_spill]] %s3971_s6 }
   0x8   :  { %4000 = sst [smem:[#allocation12_spill]] %s3972_s7 }
   0x9   :  { %4001 = sst [smem:[#allocation13_spill]] %s3983_s18 }
   0xa   :  { %s4002_s24 = sld [smem:[#allocation5_spill]]  ;;  %vm113_vm0 = vcmask 1043456   ;;  %v3325_v2 = vmov 0  }
   0xb   :  { %s4003_s18 = sld [smem:[#allocation7_spill]]  ;;  %3240 = vset.pattern.permute.xlu0 %v3325_v2 }
  0x10   :  { %v75_v0 = vld [vmem:[%s4002_s24] sm:$0xff]  ;;  %v76_v5 = vld [vmem:[%s4002_s24 + $0x8] sm:$0xff] }
  0x11   :  { %v103_v1 = vld [vmem:[%s4003_s18 + $0x60] sm:$0xf]  ;;  %v102_v3 = vld [vmem:[%s4003_s18 + $0x58] sm:$0xff]  ;;  %80 = vperm.xlu0 %3240, %v75_v0   ;;  %v101_v4 = vld [vmem:[%s4003_s18 + $0x50] sm:$0xff] }
  0x12   :  { %2993 = vmatprep.subr.msk.mxu0 %vm113_vm0, %v103_v1  ;;  %v100_v6 = vld [vmem:[%s4003_s18 + $0x48] sm:$0xff] }
  0x13   :  { %2994 = vmatpush3.msk.msra.mxu0 %vm113_vm0, %v103_v1 }
  0x14   :  { %2995 = vmatprep.subr.mxu0 %v102_v3 }
  0x15   :  { %2996 = vmatpush3.msra.mxu0 %v102_v3 }
  0x16   :  { %2997 = vmatprep.subr.mxu0 %v101_v4 }
  0x17   :  { %28 = vsyncpa [#allocation3], 0  ;;  %83 = vperm.xlu0 %3240, %v76_v5   ;;  %2998 = vmatpush3.msra.mxu0 %v101_v4  ;;  %v99_v7 = vld [vmem:[%s4003_s18 + $0x40] sm:$0xff]  ;;  %v98_v8 = vld [vmem:[%s4003_s18 + $0x38] sm:$0xff]  ;;  %v3326_v16 = vmov 0.0   ;;  %v77_v17 = vlaneseq  ;;  %vm106_vm1 = vcmask 818176  }
  0x18   :  { %2999 = vmatprep.subr.mxu0 %v100_v6  ;;  %v97_v9 = vld [vmem:[%s4003_s18 + $0x30] sm:$0xff]  ;;  %v96_v10 = vld [vmem:[%s4003_s18 + $0x28] sm:$0xff]  ;;  %v95_v11 = vld [vmem:[%s4003_s18 + $0x20] sm:$0xff]  ;;  %s4004_s24 = sld [smem:[#allocation8_spill]]  ;;  %vm200_vm4 = vcmask 261120   ;;  %vm3327_vm5 = vmmov 0  }
  0x19   :  { %3000 = vmatpush3.msra.mxu0 %v100_v6  ;;  %v94_v12 = vld [vmem:[%s4003_s18 + $0x18] sm:$0xff]  ;;  %v93_v13 = vld [vmem:[%s4003_s18 + $0x10] sm:$0xff]  ;;  %v92_v14 = vld [vmem:[%s4003_s18 + $0x8] sm:$0xff]  ;;  %v78_v18 = vand.u32 127, %v77_v17  ;;  %s4005_s1 = sld [smem:[#allocation9_spill]]  ;;  %s3328_s2 = smov 96  }
  0x1a   :  { %3001 = vmatprep.subr.mxu0 %v99_v7  ;;  %v91_v15 = vld [vmem:[%s4003_s18] sm:$0xff]  ;;  %s4006_s6 = sld [smem:[#allocation12_spill]]  ;;  %vm375_vm6 = vcmask 130048   ;;  %v3329_v6 = vmov 1966171168   ;;  %vm527_vm8 = vcmask 64512  }
  0x1b   :  { %3002 = vmatpush3.msra.mxu0 %v99_v7  ;;  %s4007_s30 = sld [smem:[#allocation10_spill]]  ;;  %v2792_v0 = vld [vmem:[%s3973_s8] ss:$0 sm:$0xff]  ;;  %v249_v7 = vunpack.c.l.s4 %v3329_v6  ;;  %s3331_s29 = smov 64   ;;  %vm1305_vm9 = vcmask 523264   ;;  %vm2609_vm10 = vcmask 1041409  }
  0x1c   :  { %3003 = vmatprep.subr.mxu0 %v98_v8  ;;  %s4008_s5 = sld [smem:[#allocation11_spill]]  ;;  %s3332_s3 = smov 80   ;;  %vm2768_vm11 = vcmask 17408  }
  0x1d   :  { %3004 = vmatpush3.msra.mxu0 %v98_v8  ;;  %s4009_s28 = sld [smem:[#allocation6_spill]]  ;;  %s3333_s0 = smov 112  }
  0x1e   :  { %3005 = vmatprep.subr.mxu0 %v97_v9  ;;  %v104_v24 = vld [vmem:[%s4004_s24] sm:$0xff]  ;;  %s3334_s4 = smov 48   ;;  %s3335_s7 = smov 16  }
  0x1f   :  { %3006 = vmatpush3.msra.mxu0 %v97_v9  ;;  %v2789_v28 = vld [vmem:[%s4005_s1] ss:$0 sm:$0xff]  ;;  %v250_v9 = vunpack.c.0.s8 %v249_v7 }
  0x20   :  { %3007 = vmatprep.subr.mxu0 %v96_v10  ;;  %v273_v43 = vld [vmem:[%s4006_s6 + $0x18] sm:$0xff]  ;;  %v272_v44 = vld [vmem:[%s4006_s6 + $0x10] sm:$0xff]  ;;  %v271_v45 = vld [vmem:[%s4006_s6 + $0x8] sm:$0xff] }
  0x21   :  { %3008 = vmatpush3.msra.mxu0 %v96_v10  ;;  %3022 = vmatprep.subr.mxu1 %v273_v43  ;;  %v270_v46 = vld [vmem:[%s4006_s6] sm:$0xff]  ;;  %v252_v10 = vshrl.u32 %v77_v17, 7 }
  0x22   :  { %3009 = vmatprep.subr.mxu0 %v95_v11  ;;  %3023 = vmatpush3.msra.mxu1 %v273_v43  ;;  %v2790_v54 = vld [vmem:[%s4007_s30] ss:$0 sm:$0xff] }
  0x23   :  { %3010 = vmatpush3.msra.mxu0 %v95_v11  ;;  %3024 = vmatprep.subr.mxu1 %v272_v44  ;;  %v2791_v56 = vld [vmem:[%s4008_s5] ss:$0 sm:$0xff]  ;;  %v253_v11 = vsub.s32 %v250_v9, %v252_v10 }
  0x24   :  { %3011 = vmatprep.subr.mxu0 %v94_v12  ;;  %3025 = vmatpush3.msra.mxu1 %v272_v44  ;;  %v244_v8 = vld [vmem:[%s4009_s28] sm:$0x3]  ;;  %s4010_s28 = sld [smem:[#allocation13_spill]] }
  0x25   :  { %3012 = vmatpush3.msra.mxu0 %v94_v12  ;;  %3026 = vmatprep.subr.mxu1 %v271_v45  ;;  %vm245_vm7 = vcmp.gt.s32.totalorder %v244_v8, 0  ;;  %v3330_v12 = vmov -1e+09  }
  0x26   :  { %3013 = vmatprep.subr.mxu0 %v93_v13  ;;  %3027 = vmatpush3.msra.mxu1 %v271_v45 }
  0x27   :  { %3014 = vmatpush3.msra.mxu0 %v93_v13  ;;  %3028 = vmatprep.subr.mxu1 %v270_v46  ;;  %v246_v13 = vsel %vm245_vm7, 0.0, %v3330_v12 }
  0x28   :  { %3015 = vmatprep.subr.mxu0 %v92_v14  ;;  %3029 = vmatpush3.msra.mxu1 %v270_v46 }
  0x29   :  { %3016 = vmatpush3.msra.mxu0 %v92_v14  ;;  %3033 = vmatprep.subr.mxu1 %v3326_v16  ;;  %v254_v14 = vrot.slane %v246_v13, %v253_v11 }
  0x2a   :  { %3017 = vmatprep.subr.mxu0 %v91_v15 }
  0x2b   :  { %3018 = vmatpush3.msra.mxu0 %v91_v15  ;;  %v364_v15 = vsub.s32 0, %v252_v10 }
  0x2c   :  { %3058 = vmatprep.subr.mxu0 %v3326_v16 }
  0x8c   :  { %v81_v19 = vpop.permute.xlu0 %80 }
  0x8d   :  { %vm85_vm2 = vcmp.eq.s32.totalorder %v78_v18, %v81_v19  ;;  %v255_v19 = vcombine.high %v254_v14, %v254_v14 }
  0x8e   :  { %v2784_v20 = vsel %vm85_vm2, 1.0, %v3326_v16 }
  0x8f   :  { %3019 = vmatprep.mubr.msk.f32.mxu0 %vm106_vm1, %v2784_v20 }
  0x92   :  { %v84_v21 = vpop.permute.xlu0 %83 }
  0x93   :  { %vm86_vm3 = vcmp.eq.s32.totalorder %v78_v18, %v84_v21  ;;  %v262_v18 = vrot.slane %v254_v14, %v253_v11  ;;  %v269_v21 = vrot.slane %v255_v19, %v253_v11 }
  0x94   :  { %v2785_v22 = vsel %vm86_vm3, 1.0, %v3326_v16 }
  0x95   :  { %3020 = vmatmul.mubr.msk.f32.vlgmr.msra.gmra.mxu0 %vm106_vm1, %v2785_v22  ;;  %v3574_v20 = vrot.slane %v262_v18, %v364_v15 }
  0x96   :  { %3060 = vmatprep.mubr.msk.f32.mxu0 %vm3327_vm5, %v3326_v16 }
 0x155   :  { %v3021_v23 = vpop.f32.mrf.mxu0 }
 0x156   :  { %v189_v26 = vadd.f32 %v3021_v23, %v104_v24 }
 0x157   :  { %v183_v25 = vpop.f32.mrf.mxu0 }
 0x158   :  { %v184_v27 = vadd.f32 %v183_v25, %v104_v24  ;;  %v197_v31 = vadd.f32 %v2789_v28, %v189_v26  ;;  %v3577_v24 = vrot.slane %v269_v21, %v364_v15 }
 0x15a   :  { %v196_v29 = vadd.f32 %v2789_v28, %v184_v27  ;;  %v204_v32 = vsel %vm200_vm4, %v197_v31, 0.0 }
 0x15c   :  { %v201_v30 = vsel %vm200_vm4, %v196_v29, 0.0 }
 0x15d   :  { %202 = vadd.xlane.f32.xlu1 %v201_v30 }
 0x161   :  { %205 = vadd.xlane.f32.xlu1 %v204_v32 }
 0x1e6   :  { %v203_v33 = vpop.xlane.xlu1 %202 }
 0x1e7   :  { %v208_v34 = vmul.f32 0.03125, %v203_v33 }
 0x1e9   :  { %v210_v35 = vsub.f32 %v196_v29, %v208_v34 }
 0x1ea   :  { %v206_v36 = vpop.xlane.xlu1 %205 }
 0x1eb   :  { %v209_v37 = vmul.f32 0.03125, %v206_v36  ;;  %v212_v38 = vmul.f32 %v210_v35, %v210_v35 }
 0x1ed   :  { %v211_v39 = vsub.f32 %v197_v31, %v209_v37  ;;  %v214_v40 = vsel %vm200_vm4, %v212_v38, 0.0 }
 0x1ee   :  { %215 = vadd.xlane.f32.xlu0 %v214_v40 }
 0x1ef   :  { %v213_v41 = vmul.f32 %v211_v39, %v211_v39 }
 0x1f1   :  { %v217_v42 = vsel %vm200_vm4, %v213_v41, 0.0 }
 0x1f2   :  { %218 = vadd.xlane.f32.xlu1 %v217_v42 }
 0x277   :  { %v216_v47 = vpop.xlane.xlu0 %215 }
 0x278   :  { %v220_v48 = vmul.f32 0.03125, %v216_v47 }
 0x27a   :  { %v222_v49 = vadd.f32 1e-12, %v220_v48 }
 0x27b   :  { %v219_v50 = vpop.xlane.xlu1 %218 }
 0x27c   :  { %3241 = vrsqrt.f32 %v222_v49  ;;  %v221_v51 = vmul.f32 0.03125, %v219_v50 }
 0x27e   :  { %v223_v52 = vadd.f32 1e-12, %v221_v51 }
 0x280   :  { %3243 = vrsqrt.f32 %v223_v52 }
 0x289   :  { %v3242_v53 = vpop.eup %3241 }
 0x28a   :  { %v226_v55 = vmul.f32 %v3242_v53, %v210_v35 }
 0x28c   :  { %v234_v57 = vmul.f32 %v2790_v54, %v226_v55 }
 0x28d   :  { %v3244_v58 = vpop.eup %3243 }
 0x28e   :  { %v227_v59 = vmul.f32 %v3244_v58, %v211_v39  ;;  %v3535_v60 = vadd.f32 %v2791_v56, %v234_v57 }
 0x290   :  { %v235_v61 = vmul.f32 %v2790_v54, %v227_v59  ;;  %3030 = vmatprep.mubr.msk.f32.mxu1 %vm200_vm4, %v3535_v60 }
 0x292   :  { %v3539_v62 = vadd.f32 %v2791_v56, %v235_v61 }
 0x294   :  { %3031 = vmatmul.mubr.msk.f32.vlgmr.msra.gmra.mxu1 %vm200_vm4, %v3539_v62 }
 0x295   :  { %3035 = vmatprep.mubr.msk.f32.mxu1 %vm3327_vm5, %v3326_v16 }
 0x354   :  { %v3032_v63 = vpop.f32.mrf.mxu1 }
 0x355   :  { %v3554_v3 = vadd.f32 %v3032_v63, %v2792_v0 }
 0x356   :  { %v353_v1 = vpop.f32.mrf.mxu1 }
 0x357   :  { %v3550_v2 = vadd.f32 %v2792_v0, %v353_v1 }
 0x359   :  { %373 = vrot.lane.b32.xlu1 %v3550_v2, %s3328_s2 }
 0x35d   :  { %451 = vrot.lane.b32.xlu1 %v3554_v3, %s3328_s2 }
 0x3cb   :  { %v374_v4 = vpop.permute.xlu1 %373 }
 0x3cc   :  { %3034 = vmatpush3.xpose.msk.msra.mxu1 %vm375_vm6, %v374_v4 }
 0x3cd   :  { %3038 = vmatprep.subr.mxu1 %v3326_v16 }
 0x3cf   :  { %3036 = vmatmul.mubr.msk.f32.vlgmr.msra.gmra.mxu1 %vm375_vm6, %v3550_v2  ;;  %v452_v5 = vpop.permute.xlu1 %451 }
 0x3d0   :  { %3039 = vmatpush3.xpose.msk.msra.mxu1 %vm375_vm6, %v452_v5  ;;  %3040 = vmatprep.mubr.msk.f32.mxu1 %vm3327_vm5, %v3326_v16 }
 0x3d1   :  { %3043 = vmatprep.subr.mxu1 %v3326_v16 }
 0x3d3   :  { %3041 = vmatmul.mubr.msk.f32.vlgmr.msra.gmra.mxu1 %vm375_vm6, %v3554_v3 }
 0x3d4   :  { %3045 = vmatprep.mubr.msk.f32.mxu1 %vm3327_vm5, %v3326_v16 }
 0x48f   :  { %v446_v22 = vpop.f32.mrf.mxu1 }
 0x490   :  { %v447_v23 = vadd.f32 %v446_v22, %v3574_v20 }
 0x491   :  { %v3037_v25 = vpop.f32.mrf.mxu1 }
 0x492   :  { %v528_v17 = vsel %vm527_vm8, %v447_v23, -inf }
 0x493   :  { %529 = vmax.xlane.f32.xlu1 %v528_v17  ;;  %v523_v26 = vpop.f32.mrf.mxu1  ;;  %v1043_v17 = vld [vmem:[%s3974_s9 + $0x8] sm:$0xff] }
 0x494   :  { %v524_v27 = vadd.f32 %v523_v26, %v3577_v24 }
 0x495   :  { %v3042_v28 = vpop.f32.mrf.mxu1 }
 0x496   :  { %v531_v29 = vsel %vm527_vm8, %v524_v27, -inf }
 0x497   :  { %532 = vmax.xlane.f32.xlu0 %v531_v29 }
 0x4a4   :  { %626 = vrot.lane.b32.xlu1 %v3554_v3, %s3331_s29 }
 0x4ad   :  { %550 = vrot.lane.b32.xlu0 %v3550_v2, %s3331_s29 }
 0x4b1   :  { %704 = vrot.lane.b32.xlu0 %v3550_v2, %s3332_s3 }
 0x4b5   :  { %782 = vrot.lane.b32.xlu0 %v3554_v3, %s3332_s3 }
 0x51c   :  { %v530_v30 = vpop.xlane.xlu1 %529 }
 0x51d   :  { %v534_v31 = vsub.f32 %v447_v23, %v530_v30 }
 0x51f   :  { %v536_v32 = vmul.f32 1.442695, %v534_v31 }
 0x520   :  { %v533_v33 = vpop.xlane.xlu0 %532  ;;  %v627_v49 = vpop.permute.xlu1 %626 }
 0x521   :  { %3245 = vpow2.f32 %v536_v32  ;;  %v535_v34 = vsub.f32 %v524_v27, %v533_v33  ;;  %v1042_v27 = vld [vmem:[%s3974_s9] sm:$0xff] }
 0x523   :  { %v538_v35 = vmul.f32 1.442695, %v535_v34 }
 0x524   :  { %v551_v36 = vpop.permute.xlu0 %550 }
 0x525   :  { %3247 = vpow2.f32 %v538_v35  ;;  %3044 = vmatpush3.msra.mxu1 %v551_v36  ;;  %v2807_v35 = vld [vmem:[%s3975_s10] ss:$0 sm:$0xff] }
 0x526   :  { %3048 = vmatprep.subr.mxu1 %v3326_v16 }
 0x528   :  { %v705_v37 = vpop.permute.xlu0 %704 }
 0x52c   :  { %v783_v38 = vpop.permute.xlu0 %782 }
 0x52d   :  { %3059 = vmatpush3.xpose.msk.msra.mxu0 %vm375_vm6, %v783_v38 }
 0x52e   :  { %v3246_v39 = vpop.eup %3245  ;;  %3068 = vmatprep.subr.mxu0 %v3326_v16 }
 0x52f   :  { %v540_v40 = vsel %vm527_vm8, %v3246_v39, 0.0 }
 0x530   :  { %541 = vadd.xlane.f32.xlu0 %v540_v40 }
 0x532   :  { %v3248_v41 = vpop.eup %3247 }
 0x533   :  { %v543_v42 = vsel %vm527_vm8, %v3248_v41, 0.0 }
 0x534   :  { %544 = vadd.xlane.f32.xlu0 %v543_v42 }
 0x54a   :  { %702 = vrot.lane.b32.xlu0 %v3550_v2, %s3333_s0 }
 0x54e   :  { %780 = vrot.lane.b32.xlu0 %v3554_v3, %s3333_s0 }
 0x5b9   :  { %v542_v43 = vpop.xlane.xlu0 %541 }
 0x5ba   :  { %3249 = vrcp.f32 %v542_v43 }
 0x5bd   :  { %v545_v44 = vpop.xlane.xlu0 %544 }
 0x5be   :  { %3251 = vrcp.f32 %v545_v44 }
 0x5c1   :  { %v703_v45 = vpop.permute.xlu0 %702 }
 0x5c5   :  { %v781_v46 = vpop.permute.xlu0 %780 }
 0x5c6   :  { %3061 = vmatmul.mubr.msk.f32.vlgmr.msra.gmra.mxu0 %vm375_vm6, %v781_v46 }
 0x5c7   :  { %v3250_v47 = vpop.eup %3249  ;;  %3070 = vmatprep.mubr.msk.f32.mxu0 %vm3327_vm5, %v3326_v16 }
 0x5c8   :  { %v548_v48 = vmul.f32 %v3250_v47, %v3246_v39 }
 0x5ca   :  { %3046 = vmatmul.mubr.msk.f32.vlgmr.msra.gmra.mxu1 %vm527_vm8, %v548_v48 }
 0x5cb   :  { %v3252_v50 = vpop.eup %3251  ;;  %3049 = vmatpush3.msra.mxu1 %v627_v49  ;;  %3050 = vmatprep.mubr.msk.f32.mxu1 %vm3327_vm5, %v3326_v16 }
 0x5cc   :  { %3053 = vmatprep.subr.mxu1 %v3326_v16  ;;  %v549_v51 = vmul.f32 %v3252_v50, %v3248_v41 }
 0x5ce   :  { %3051 = vmatmul.mubr.msk.f32.vlgmr.msra.gmra.mxu1 %vm527_vm8, %v549_v51 }
 0x5cf   :  { %3054 = vmatpush3.xpose.msk.msra.mxu1 %vm375_vm6, %v705_v37  ;;  %3055 = vmatprep.mubr.msk.f32.mxu1 %vm3327_vm5, %v3326_v16 }
 0x5d0   :  { %3063 = vmatprep.subr.mxu1 %v3326_v16 }
 0x5d2   :  { %3056 = vmatmul.mubr.msk.f32.vlgmr.msra.gmra.mxu1 %vm375_vm6, %v703_v45 }
 0x5d3   :  { %3065 = vmatprep.mubr.msk.f32.mxu1 %vm3327_vm5, %v3326_v16 }
 0x686   :  { %v854_v52 = vpop.f32.mrf.mxu0 }
 0x687   :  { %v855_v53 = vadd.f32 %v854_v52, %v3577_v24 }
 0x688   :  { %v3062_v54 = vpop.f32.mrf.mxu0 }
 0x689   :  { %v861_v55 = vsel %vm527_vm8, %v855_v53, -inf  ;;  %v1181_v54 = vld [vmem:[%s3978_s13 + $0x8] sm:$0xff] }
 0x68a   :  { %v3616_v56 = vpop.f32.mrf.mxu1  ;;  %862 = vmax.xlane.f32.xlu0 %v861_v55  ;;  %v1180_v55 = vld [vmem:[%s3978_s13] sm:$0xff] }
 0x68c   :  { %v3047_v57 = vpop.f32.mrf.mxu1 }
 0x68e   :  { %v698_v58 = vpop.f32.mrf.mxu1 }
 0x690   :  { %v3052_v59 = vpop.f32.mrf.mxu1 }
 0x692   :  { %v776_v61 = vpop.f32.mrf.mxu1 }
 0x693   :  { %v777_v63 = vadd.f32 %v776_v61, %v3574_v20 }
 0x694   :  { %v3057_v0 = vpop.f32.mrf.mxu1 }
 0x695   :  { %v858_v1 = vsel %vm527_vm8, %v777_v63, -inf }
 0x696   :  { %859 = vmax.xlane.f32.xlu1 %v858_v1  ;;  %v2810_v1 = vld [vmem:[%s3976_s11] ss:$0 sm:$0xff] }
 0x713   :  { %v863_v4 = vpop.xlane.xlu0 %862 }
 0x714   :  { %v865_v5 = vsub.f32 %v855_v53, %v863_v4  ;;  %v1182_v53 = vld [vmem:[%s3978_s13 + $0x10] sm:$0xff] }
 0x716   :  { %v868_v6 = vmul.f32 1.442695, %v865_v5 }
 0x718   :  { %3253 = vpow2.f32 %v868_v6 }
 0x71f   :  { %v860_v7 = vpop.xlane.xlu1 %859 }
 0x720   :  { %v864_v8 = vsub.f32 %v777_v63, %v860_v7 }
 0x722   :  { %v866_v9 = vmul.f32 1.442695, %v864_v8  ;;  %v2811_v8 = vld [vmem:[%s3977_s12] ss:$0 sm:$0xff] }
 0x724   :  { %3255 = vpow2.f32 %v866_v9 }
 0x725   :  { %v3254_v10 = vpop.eup %3253 }
 0x726   :  { %v873_v11 = vsel %vm527_vm8, %v3254_v10, 0.0 }
 0x727   :  { %874 = vadd.xlane.f32.xlu1 %v873_v11 }
 0x731   :  { %v3256_v12 = vpop.eup %3255 }
 0x732   :  { %v870_v13 = vsel %vm527_vm8, %v3256_v12, 0.0 }
 0x733   :  { %871 = vadd.xlane.f32.xlu0 %v870_v13  ;;  %v1296_v13 = vld [vmem:[%s3980_s15 + $0x30] sm:$0xff] }
 0x738   :  { %956 = vrot.lane.b32.xlu1 %v3554_v3, %s3334_s4  ;;  %v1044_v3 = vld [vmem:[%s3974_s9 + $0x10] sm:$0xff] }
 0x749   :  { %880 = vrot.lane.b32.xlu0 %v3550_v2, %s3334_s4  ;;  %v1045_v2 = vld [vmem:[%s3974_s9 + $0x18] sm:$0xff] }
 0x7b0   :  { %v875_v14 = vpop.xlane.xlu1 %874 }
 0x7b1   :  { %3257 = vrcp.f32 %v875_v14  ;;  %v1295_v14 = vld [vmem:[%s3980_s15 + $0x28] sm:$0xff] }
 0x7b4   :  { %v957_v15 = vpop.permute.xlu1 %956 }
 0x7b5   :  { %3069 = vmatpush3.msra.mxu0 %v957_v15  ;;  %v1294_v15 = vld [vmem:[%s3980_s15 + $0x20] sm:$0xff] }
 0x7bc   :  { %v872_v18 = vpop.xlane.xlu0 %871 }
 0x7bd   :  { %3259 = vrcp.f32 %v872_v18  ;;  %v1293_v18 = vld [vmem:[%s3980_s15 + $0x18] sm:$0xff] }
 0x7be   :  { %v3258_v19 = vpop.eup %3257 }
 0x7bf   :  { %v879_v21 = vmul.f32 %v3258_v19, %v3254_v10  ;;  %v1292_v19 = vld [vmem:[%s3980_s15 + $0x10] sm:$0xff] }
 0x7c0   :  { %v881_v22 = vpop.permute.xlu0 %880 }
 0x7c1   :  { %3064 = vmatpush3.msra.mxu1 %v881_v22  ;;  %3071 = vmatmul.mubr.msk.f32.vlgmr.msra.gmra.mxu0 %vm527_vm8, %v879_v21  ;;  %v1291_v21 = vld [vmem:[%s3980_s15 + $0x8] sm:$0xff]  ;;  %v1290_v22 = vld [vmem:[%s3980_s15] sm:$0xff] }
 0x7c2   :  { %3073 = vmatprep.subr.mxu1 %v1045_v2 }
 0x7ca   :  { %v3260_v23 = vpop.eup %3259 }
 0x7cb   :  { %v878_v25 = vmul.f32 %v3260_v23, %v3256_v12  ;;  %v1297_v12 = vld [vmem:[%s3980_s15 + $0x38] sm:$0xff]  ;;  %v2812_v23 = vld [vmem:[%s3979_s14] ss:$0 sm:$0xff] }
 0x7cd   :  { %3066 = vmatmul.mubr.msk.f32.vlgmr.msra.gmra.mxu1 %vm527_vm8, %v878_v25 }
 0x7ce   :  { %3074 = vmatpush3.msra.mxu1 %v1045_v2 }
 0x7cf   :  { %3075 = vmatprep.subr.mxu1 %v1044_v3 }
 0x7d0   :  { %3076 = vmatpush3.msra.mxu1 %v1044_v3 }
 0x7d1   :  { %3077 = vmatprep.subr.mxu1 %v1043_v17 }
 0x7d2   :  { %3078 = vmatpush3.msra.mxu1 %v1043_v17 }
 0x7d3   :  { %3079 = vmatprep.subr.mxu1 %v1042_v27 }
 0x7d4   :  { %3080 = vmatpush3.msra.mxu1 %v1042_v27 }
 0x7d5   :  { %3095 = vmatprep.subr.mxu1 %v1297_v12 }
 0x881   :  { %v1028_v26 = vpop.f32.mrf.mxu0 }
 0x882   :  { %1036 = vrot.lane.b32.xlu0 %v1028_v26, %s3335_s7 }
 0x883   :  { %v3072_v28 = vpop.f32.mrf.mxu0 }
 0x88d   :  { %v952_v29 = vpop.f32.mrf.mxu1 }
 0x88e   :  { %1034 = vrot.lane.b32.xlu1 %v952_v29, %s3335_s7 }
 0x88f   :  { %v3067_v30 = vpop.f32.mrf.mxu1 }
 0x8f4   :  { %v1037_v31 = vpop.permute.xlu0 %1036 }
 0x8f5   :  { %v1041_v34 = vsel %vm375_vm6, %v698_v58, %v1037_v31 }
 0x900   :  { %v1035_v32 = vpop.permute.xlu1 %1034 }
 0x901   :  { %v1040_v33 = vsel %vm375_vm6, %v3616_v56, %v1035_v32 }
 0x902   :  { %3081 = vmatprep.mubr.msk.f32.mxu1 %vm200_vm4, %v1040_v33 }
 0x903   :  { %3082 = vmatmul.mubr.msk.f32.vlgmr.msra.gmra.mxu1 %vm200_vm4, %v1041_v34 }
 0x904   :  { %3096 = vmatpush3.msra.mxu1 %v1297_v12  ;;  %v2818_v12 = vld [vmem:[%s3982_s17] ss:$0 sm:$0xff] }
 0x905   :  { %3097 = vmatprep.subr.mxu1 %v1296_v13 }
 0x906   :  { %3098 = vmatpush3.msra.mxu1 %v1296_v13 }
 0x907   :  { %3099 = vmatprep.subr.mxu1 %v1295_v14 }
 0x908   :  { %3100 = vmatpush3.msra.mxu1 %v1295_v14 }
 0x909   :  { %3101 = vmatprep.subr.mxu1 %v1294_v15 }
 0x90a   :  { %3102 = vmatpush3.msra.mxu1 %v1294_v15 }
 0x90b   :  { %3103 = vmatprep.subr.mxu1 %v1293_v18 }
 0x90c   :  { %3104 = vmatpush3.msra.mxu1 %v1293_v18 }
 0x90d   :  { %3105 = vmatprep.subr.mxu1 %v1292_v19 }
 0x90e   :  { %3106 = vmatpush3.msra.mxu1 %v1292_v19  ;;  %v2819_v19 = vld [vmem:[%s4010_s28] ss:$0 sm:$0xff] }
 0x90f   :  { %3107 = vmatprep.subr.mxu1 %v1291_v21 }
 0x910   :  { %3108 = vmatpush3.msra.mxu1 %v1291_v21 }
 0x911   :  { %3109 = vmatprep.subr.mxu1 %v1290_v22 }
 0x912   :  { %3110 = vmatpush3.msra.mxu1 %v1290_v22 }
 0x913   :  { %3135 = vmatprep.subr.mxu1 %v3326_v16 }
 0x9c3   :  { %v3083_v36 = vpop.f32.mrf.mxu1 }
 0x9c4   :  { %v1131_v37 = vadd.f32 %v3083_v36, %v2807_v35 }
 0x9c5   :  { %v1125_v38 = vpop.f32.mrf.mxu1 }
 0x9c6   :  { %v1126_v39 = vadd.f32 %v2807_v35, %v1125_v38  ;;  %v1135_v40 = vadd.f32 %v1131_v37, %v3539_v62 }
 0x9c8   :  { %v1141_v41 = vsel %vm200_vm4, %v1135_v40, 0.0  ;;  %v1134_v42 = vadd.f32 %v1126_v39, %v3535_v60  ;;  %v1183_v60 = vld [vmem:[%s3978_s13 + $0x18] sm:$0xff] }
 0x9c9   :  { %1142 = vadd.xlane.f32.xlu0 %v1141_v41  ;;  %3084 = vmatprep.subr.mxu0 %v1183_v60 }
 0x9ca   :  { %v1138_v43 = vsel %vm200_vm4, %v1134_v42, 0.0  ;;  %3085 = vmatpush3.msra.mxu0 %v1183_v60 }
 0x9cb   :  { %1139 = vadd.xlane.f32.xlu1 %v1138_v43  ;;  %3086 = vmatprep.subr.mxu0 %v1182_v53 }
 0x9cc   :  { %3087 = vmatpush3.msra.mxu0 %v1182_v53 }
 0x9cd   :  { %3088 = vmatprep.subr.mxu0 %v1181_v54 }
 0x9ce   :  { %3089 = vmatpush3.msra.mxu0 %v1181_v54 }
 0x9cf   :  { %3090 = vmatprep.subr.mxu0 %v1180_v55 }
 0x9d0   :  { %3091 = vmatpush3.msra.mxu0 %v1180_v55 }
 0xa52   :  { %v1143_v44 = vpop.xlane.xlu0 %1142 }
 0xa53   :  { %v1145_v45 = vmul.f32 0.03125, %v1143_v44  ;;  %v2815_v44 = vld [vmem:[%s3981_s16] ss:$0 sm:$0xff] }
 0xa54   :  { %v1140_v46 = vpop.xlane.xlu1 %1139 }
 0xa55   :  { %v1147_v47 = vsub.f32 %v1135_v40, %v1145_v45  ;;  %v1144_v48 = vmul.f32 0.03125, %v1140_v46 }
 0xa57   :  { %v1146_v49 = vsub.f32 %v1134_v42, %v1144_v48  ;;  %v1149_v50 = vmul.f32 %v1147_v47, %v1147_v47 }
 0xa59   :  { %v1153_v51 = vsel %vm200_vm4, %v1149_v50, 0.0  ;;  %v1148_v52 = vmul.f32 %v1146_v49, %v1146_v49 }
 0xa5a   :  { %1154 = vadd.xlane.f32.xlu1 %v1153_v51 }
 0xa5b   :  { %v1150_v62 = vsel %vm200_vm4, %v1148_v52, 0.0 }
 0xa5c   :  { %1151 = vadd.xlane.f32.xlu0 %v1150_v62 }
 0xae3   :  { %v1155_v56 = vpop.xlane.xlu1 %1154 }
 0xae4   :  { %v1157_v57 = vmul.f32 0.03125, %v1155_v56 }
 0xae5   :  { %v1152_v58 = vpop.xlane.xlu0 %1151 }
 0xae6   :  { %v1159_v59 = vadd.f32 1e-12, %v1157_v57  ;;  %v1156_v61 = vmul.f32 0.03125, %v1152_v58 }
 0xae8   :  { %3261 = vrsqrt.f32 %v1159_v59  ;;  %v1158_v63 = vadd.f32 1e-12, %v1156_v61 }
 0xaea   :  { %3263 = vrsqrt.f32 %v1158_v63  ;;  %v2823_v63 = vld [vmem:[%s4006_s6 + $0x38] sm:$0xff] }
 0xaeb   :  { %3114 = vmatprep.subr.mxu0 %v2823_v63 }
 0xaf5   :  { %v3262_v0 = vpop.eup %3261 }
 0xaf6   :  { %v1163_v4 = vmul.f32 %v3262_v0, %v1147_v47  ;;  %v2822_v0 = vld [vmem:[%s4006_s6 + $0x30] sm:$0xff] }
 0xaf7   :  { %v3264_v5 = vpop.eup %3263 }
 0xaf8   :  { %v1162_v6 = vmul.f32 %v3264_v5, %v1146_v49  ;;  %v1171_v7 = vmul.f32 %v2810_v1, %v1163_v4  ;;  %v2820_v4 = vld [vmem:[%s4006_s6 + $0x20] sm:$0xff] }
 0xafa   :  { %v1170_v9 = vmul.f32 %v2810_v1, %v1162_v6  ;;  %v1179_v11 = vadd.f32 %v2811_v8, %v1171_v7  ;;  %v2821_v1 = vld [vmem:[%s4006_s6 + $0x28] sm:$0xff] }
 0xafc   :  { %v3674_v10 = vadd.f32 %v2811_v8, %v1170_v9 }
 0xafe   :  { %3092 = vmatprep.mubr.msk.f32.mxu0 %vm200_vm4, %v3674_v10 }
 0xaff   :  { %3093 = vmatmul.mubr.msk.f32.vlgmr.msra.gmra.mxu0 %vm200_vm4, %v1179_v11 }
 0xb00   :  { %3115 = vmatpush3.msra.mxu0 %v2823_v63 }
 0xb01   :  { %3116 = vmatprep.subr.mxu0 %v2822_v0 }
 0xb02   :  { %3117 = vmatpush3.msra.mxu0 %v2822_v0 }
 0xb03   :  { %3118 = vmatprep.subr.mxu0 %v2821_v1 }
 0xb04   :  { %3119 = vmatpush3.msra.mxu0 %v2821_v1 }
 0xb05   :  { %3120 = vmatprep.subr.mxu0 %v2820_v4 }
 0xb06   :  { %3121 = vmatpush3.msra.mxu0 %v2820_v4 }
 0xb07   :  { %3125 = vmatprep.subr.mxu0 %v3326_v16 }
 0xbbf   :  { %v3094_v25 = vpop.f32.mrf.mxu0 }
 0xbc0   :  { %v1269_v2 = vadd.f32 %v3094_v25, %v2812_v23  ;;  %v2825_v25 = vld [vmem:[%s3973_s8 + $0x1] ss:$0 sm:$0xff] }
 0xbc1   :  { %v1263_v3 = vpop.f32.mrf.mxu0 }
 0xbc2   :  { %v1273_v17 = vmul.f32 %v1269_v2, %v1269_v2  ;;  %v1264_v26 = vadd.f32 %v2812_v23, %v1263_v3 }
 0xbc4   :  { %v1275_v27 = vmul.f32 %v1273_v17, %v1269_v2  ;;  %v1272_v28 = vmul.f32 %v1264_v26, %v1264_v26 }
 0xbc6   :  { %v1277_v29 = vmul.f32 0.044715, %v1275_v27  ;;  %v1274_v30 = vmul.f32 %v1272_v28, %v1264_v26 }
 0xbc8   :  { %v1279_v31 = vadd.f32 %v1277_v29, %v1269_v2  ;;  %v1276_v32 = vmul.f32 0.044715, %v1274_v30 }
 0xbca   :  { %v1281_v33 = vmul.f32 0.7978846, %v1279_v31  ;;  %v1278_v34 = vadd.f32 %v1276_v32, %v1264_v26 }
 0xbcc   :  { %3265 = vtanh.f32 %v1281_v33  ;;  %v1280_v35 = vmul.f32 0.7978846, %v1278_v34 }
 0xbce   :  { %3267 = vtanh.f32 %v1280_v35 }
 0xbd9   :  { %v3266_v36 = vpop.eup %3265 }
 0xbda   :  { %v1285_v37 = vadd.f32 1.0, %v3266_v36 }
 0xbdb   :  { %v3268_v38 = vpop.eup %3267 }
 0xbdc   :  { %v1284_v39 = vadd.f32 1.0, %v3268_v38  ;;  %v1287_v40 = vmul.f32 0.5, %v1285_v37 }
 0xbde   :  { %v1286_v41 = vmul.f32 0.5, %v1284_v39  ;;  %v1289_v43 = vmul.f32 %v1287_v40, %v1269_v2 }
 0xbe0   :  { %v1288_v42 = vmul.f32 %v1286_v41, %v1264_v26 }
 0xbe2   :  { %3111 = vmatprep.mubr.msk.f32.mxu1 %vm1305_vm9, %v1288_v42 }
 0xbe3   :  { %3112 = vmatmul.mubr.msk.f32.vlgmr.msra.gmra.mxu1 %vm1305_vm9, %v1289_v43 }
 0xbe4   :  { %3137 = vmatprep.mubr.msk.f32.mxu1 %vm3327_vm5, %v3326_v16 }
 0xca3   :  { %v3113_v45 = vpop.f32.mrf.mxu1 }
 0xca4   :  { %v1384_v46 = vadd.f32 %v3113_v45, %v2815_v44 }
 0xca5   :  { %v1378_v47 = vpop.f32.mrf.mxu1 }
 0xca6   :  { %v1379_v48 = vadd.f32 %v2815_v44, %v1378_v47  ;;  %v1388_v49 = vadd.f32 %v1384_v46, %v1179_v11 }
 0xca8   :  { %v1394_v50 = vsel %vm200_vm4, %v1388_v49, 0.0  ;;  %v1387_v51 = vadd.f32 %v1379_v48, %v3674_v10 }
 0xca9   :  { %1395 = vadd.xlane.f32.xlu1 %v1394_v50 }
 0xcaa   :  { %v1391_v52 = vsel %vm200_vm4, %v1387_v51, 0.0 }
 0xcab   :  { %1392 = vadd.xlane.f32.xlu0 %v1391_v52 }
 0xd32   :  { %v1396_v62 = vpop.xlane.xlu1 %1395 }
 0xd33   :  { %v1398_v60 = vmul.f32 0.03125, %v1396_v62 }
 0xd34   :  { %v1393_v53 = vpop.xlane.xlu0 %1392 }
 0xd35   :  { %v1400_v54 = vsub.f32 %v1388_v49, %v1398_v60  ;;  %v1397_v55 = vmul.f32 0.03125, %v1393_v53 }
 0xd37   :  { %v1399_v56 = vsub.f32 %v1387_v51, %v1397_v55  ;;  %v1402_v57 = vmul.f32 %v1400_v54, %v1400_v54 }
 0xd39   :  { %v1406_v58 = vsel %vm200_vm4, %v1402_v57, 0.0  ;;  %v1401_v59 = vmul.f32 %v1399_v56, %v1399_v56 }
 0xd3a   :  { %1407 = vadd.xlane.f32.xlu1 %v1406_v58 }
 0xd3b   :  { %v1403_v61 = vsel %vm200_vm4, %v1401_v59, 0.0 }
 0xd3c   :  { %1404 = vadd.xlane.f32.xlu0 %v1403_v61 }
 0xdc3   :  { %v1408_v5 = vpop.xlane.xlu1 %1407 }
 0xdc4   :  { %v1410_v6 = vmul.f32 0.03125, %v1408_v5 }
 0xdc5   :  { %v1405_v7 = vpop.xlane.xlu0 %1404 }
 0xdc6   :  { %v1412_v8 = vadd.f32 1e-12, %v1410_v6  ;;  %v1409_v9 = vmul.f32 0.03125, %v1405_v7 }
 0xdc8   :  { %3269 = vrsqrt.f32 %v1412_v8  ;;  %v1411_v10 = vadd.f32 1e-12, %v1409_v9 }
 0xdca   :  { %3271 = vrsqrt.f32 %v1411_v10 }
 0xdd5   :  { %v3270_v11 = vpop.eup %3269 }
 0xdd6   :  { %v1416_v13 = vmul.f32 %v3270_v11, %v1400_v54 }
 0xdd7   :  { %v3272_v14 = vpop.eup %3271 }
 0xdd8   :  { %v1415_v15 = vmul.f32 %v3272_v14, %v1399_v56  ;;  %v1424_v18 = vmul.f32 %v2818_v12, %v1416_v13 }
 0xdda   :  { %v1423_v21 = vmul.f32 %v2818_v12, %v1415_v15  ;;  %v3740_v23 = vadd.f32 %v2819_v19, %v1424_v18 }
 0xddc   :  { %v3738_v22 = vadd.f32 %v2819_v19, %v1423_v21 }
 0xdde   :  { %3122 = vmatprep.mubr.msk.f32.mxu0 %vm200_vm4, %v3738_v22 }
 0xddf   :  { %3123 = vmatmul.mubr.msk.f32.vlgmr.msra.gmra.mxu0 %vm200_vm4, %v3740_v23 }
 0xde0   :  { %3127 = vmatprep.mubr.msk.f32.mxu0 %vm3327_vm5, %v3326_v16 }
 0xe9f   :  { %v3124_v2 = vpop.f32.mrf.mxu0 }
 0xea0   :  { %v3751_v3 = vadd.f32 %v3124_v2, %v2825_v25 }
 0xea1   :  { %v1518_v17 = vpop.f32.mrf.mxu0 }
 0xea2   :  { %v3753_v26 = vadd.f32 %v2825_v25, %v1518_v17  ;;  %1605 = vrot.lane.b32.xlu1 %v3751_v3, %s3328_s2 }
 0xea4   :  { %1528 = vrot.lane.b32.xlu0 %v3753_v26, %s3328_s2 }
 0xf14   :  { %v1606_v28 = vpop.permute.xlu1 %1605 }
 0xf16   :  { %v1529_v27 = vpop.permute.xlu0 %1528 }
 0xf17   :  { %3126 = vmatpush3.xpose.msk.msra.mxu0 %vm375_vm6, %v1529_v27 }
 0xf18   :  { %3130 = vmatprep.subr.mxu0 %v3326_v16 }
 0xf1a   :  { %3128 = vmatmul.mubr.msk.f32.vlgmr.msra.gmra.mxu0 %vm375_vm6, %v3753_v26 }
 0xf1b   :  { %3131 = vmatpush3.xpose.msk.msra.mxu0 %vm375_vm6, %v1606_v28  ;;  %3132 = vmatprep.mubr.msk.f32.mxu0 %vm3327_vm5, %v3326_v16 }
 0xf1c   :  { %3140 = vmatprep.subr.mxu0 %v3326_v16 }
 0xf1e   :  { %3133 = vmatmul.mubr.msk.f32.vlgmr.msra.gmra.mxu0 %vm375_vm6, %v3751_v3 }
 0xf1f   :  { %3142 = vmatprep.mubr.msk.f32.mxu0 %vm3327_vm5, %v3326_v16 }
 0xfda   :  { %v1600_v29 = vpop.f32.mrf.mxu0 }
 0xfdb   :  { %v1601_v30 = vadd.f32 %v1600_v29, %v3574_v20 }
 0xfdc   :  { %v3129_v31 = vpop.f32.mrf.mxu0 }
 0xfdd   :  { %v1681_v32 = vsel %vm527_vm8, %v1601_v30, -inf  ;;  %v2840_v31 = vld [vmem:[%s3974_s9 + $0x20] sm:$0xff] }
 0xfde   :  { %1682 = vmax.xlane.f32.xlu1 %v1681_v32  ;;  %v1677_v33 = vpop.f32.mrf.mxu0 }
 0xfdf   :  { %v1678_v34 = vadd.f32 %v1677_v33, %v3577_v24 }
 0xfe0   :  { %v3134_v35 = vpop.f32.mrf.mxu0 }
 0xfe1   :  { %v1684_v36 = vsel %vm527_vm8, %v1678_v34, -inf }
 0xfe2   :  { %1685 = vmax.xlane.f32.xlu0 %v1684_v36 }
 0xfef   :  { %1779 = vrot.lane.b32.xlu1 %v3751_v3, %s3331_s29 }
 0xff3   :  { %1857 = vrot.lane.b32.xlu1 %v3753_v26, %s3332_s3 }
 0xff8   :  { %1703 = vrot.lane.b32.xlu0 %v3753_v26, %s3331_s29 }
0x1067   :  { %v1683_v37 = vpop.xlane.xlu1 %1682 }
0x1068   :  { %v1687_v38 = vsub.f32 %v1601_v30, %v1683_v37  ;;  %v2841_v30 = vld [vmem:[%s3974_s9 + $0x28] sm:$0xff] }
0x106a   :  { %v1689_v39 = vmul.f32 1.442695, %v1687_v38 }
0x106b   :  { %v1780_v40 = vpop.permute.xlu1 %1779  ;;  %v1686_v41 = vpop.xlane.xlu0 %1685 }
0x106c   :  { %3273 = vpow2.f32 %v1689_v39  ;;  %v1688_v42 = vsub.f32 %v1678_v34, %v1686_v41  ;;  %3141 = vmatpush3.msra.mxu0 %v1780_v40  ;;  %v2845_v40 = vld [vmem:[%s3975_s10 + $0x1] ss:$0 sm:$0xff] }
0x106d   :  { %3150 = vmatprep.subr.mxu0 %v3326_v16 }
0x106e   :  { %v1691_v43 = vmul.f32 1.442695, %v1688_v42 }
0x106f   :  { %v1704_v44 = vpop.permute.xlu0 %1703  ;;  %v1858_v49 = vpop.permute.xlu1 %1857 }
0x1070   :  { %3275 = vpow2.f32 %v1691_v43  ;;  %3136 = vmatpush3.msra.mxu1 %v1704_v44 }
0x1071   :  { %3145 = vmatprep.subr.mxu1 %v3326_v16 }
0x1079   :  { %v3274_v45 = vpop.eup %3273 }
0x107a   :  { %v1693_v46 = vsel %vm527_vm8, %v3274_v45, 0.0 }
0x107b   :  { %1694 = vadd.xlane.f32.xlu0 %v1693_v46 }
0x107d   :  { %v3276_v47 = vpop.eup %3275 }
0x107e   :  { %v1696_v48 = vsel %vm527_vm8, %v3276_v47, 0.0 }
0x107f   :  { %1697 = vadd.xlane.f32.xlu1 %v1696_v48 }
0x1090   :  { %1855 = vrot.lane.b32.xlu1 %v3753_v26, %s3333_s0 }
0x1091   :  { %1935 = vrot.lane.b32.xlu0 %v3751_v3, %s3332_s3 }
0x1095   :  { %1933 = vrot.lane.b32.xlu0 %v3751_v3, %s3333_s0 }
0x1104   :  { %v1695_v50 = vpop.xlane.xlu0 %1694 }
0x1105   :  { %3277 = vrcp.f32 %v1695_v50 }
0x1108   :  { %v1698_v51 = vpop.xlane.xlu1 %1697  ;;  %v1936_v53 = vpop.permute.xlu0 %1935 }
0x1109   :  { %3279 = vrcp.f32 %v1698_v51 }
0x110c   :  { %v1856_v55 = vpop.permute.xlu1 %1855  ;;  %v1934_v56 = vpop.permute.xlu0 %1933 }
0x1112   :  { %v3278_v52 = vpop.eup %3277 }
0x1113   :  { %v1701_v62 = vmul.f32 %v3278_v52, %v3274_v45 }
0x1115   :  { %3138 = vmatmul.mubr.msk.f32.vlgmr.msra.gmra.mxu1 %vm527_vm8, %v1701_v62 }
0x1116   :  { %v3280_v60 = vpop.eup %3279  ;;  %3146 = vmatpush3.xpose.msk.msra.mxu1 %vm375_vm6, %v1858_v49  ;;  %3147 = vmatprep.mubr.msk.f32.mxu1 %vm3327_vm5, %v3326_v16 }
0x1117   :  { %v1702_v54 = vmul.f32 %v3280_v60, %v3276_v47  ;;  %3155 = vmatprep.subr.mxu1 %v3326_v16 }
0x1119   :  { %3143 = vmatmul.mubr.msk.f32.vlgmr.msra.gmra.mxu0 %vm527_vm8, %v1702_v54  ;;  %3148 = vmatmul.mubr.msk.f32.vlgmr.msra.gmra.mxu1 %vm375_vm6, %v1856_v55 }
0x111a   :  { %3151 = vmatpush3.xpose.msk.msra.mxu0 %vm375_vm6, %v1936_v53  ;;  %3152 = vmatprep.mubr.msk.f32.mxu0 %vm3327_vm5, %v3326_v16 }
0x111b   :  { %3160 = vmatprep.subr.mxu0 %v3326_v16  ;;  %3157 = vmatprep.mubr.msk.f32.mxu1 %vm3327_vm5, %v3326_v16 }
0x111d   :  { %3153 = vmatmul.mubr.msk.f32.vlgmr.msra.gmra.mxu0 %vm375_vm6, %v1934_v56  ;;  %v2854_v56 = vld [vmem:[%s3978_s13 + $0x30] sm:$0xff] }
0x111e   :  { %3162 = vmatprep.mubr.msk.f32.mxu0 %vm3327_vm5, %v3326_v16 }
0x11d5   :  { %v3807_v57 = vpop.f32.mrf.mxu1 }
0x11d7   :  { %v3139_v58 = vpop.f32.mrf.mxu1 }
0x11d8   :  { %v2852_v58 = vld [vmem:[%s3978_s13 + $0x20] sm:$0xff] }
0x11d9   :  { %v3809_v59 = vpop.f32.mrf.mxu0  ;;  %v1929_v61 = vpop.f32.mrf.mxu1 }
0x11da   :  { %v1930_v63 = vadd.f32 %v1929_v61, %v3574_v20 }
0x11db   :  { %v3144_v0 = vpop.f32.mrf.mxu0  ;;  %v3149_v1 = vpop.f32.mrf.mxu1 }
0x11dc   :  { %v2011_v4 = vsel %vm527_vm8, %v1930_v63, -inf }
0x11dd   :  { %2012 = vmax.xlane.f32.xlu1 %v2011_v4  ;;  %v2007_v5 = vpop.f32.mrf.mxu0 }
0x11de   :  { %v2008_v6 = vadd.f32 %v2007_v5, %v3577_v24 }
0x11df   :  { %v3154_v7 = vpop.f32.mrf.mxu0 }
0x11e0   :  { %v2014_v8 = vsel %vm527_vm8, %v2008_v6, -inf }
0x11e1   :  { %2015 = vmax.xlane.f32.xlu0 %v2014_v8 }
0x1266   :  { %v2013_v9 = vpop.xlane.xlu1 %2012 }
0x1267   :  { %v2017_v10 = vsub.f32 %v1930_v63, %v2013_v9 }
0x1269   :  { %v2019_v11 = vmul.f32 1.442695, %v2017_v10 }
0x126a   :  { %v2016_v12 = vpop.xlane.xlu0 %2015 }
0x126b   :  { %3281 = vpow2.f32 %v2019_v11  ;;  %v2018_v13 = vsub.f32 %v2008_v6, %v2016_v12  ;;  %v2850_v6 = vld [vmem:[%s3976_s11 + $0x1] ss:$0 sm:$0xff] }
0x126c   :  { %v2851_v11 = vld [vmem:[%s3977_s12 + $0x1] ss:$0 sm:$0xff] }
0x126d   :  { %v2021_v14 = vmul.f32 1.442695, %v2018_v13 }
0x126f   :  { %3283 = vpow2.f32 %v2021_v14 }
0x1278   :  { %v3282_v20 = vpop.eup %3281 }
0x1279   :  { %v2023_v15 = vsel %vm527_vm8, %v3282_v20, 0.0 }
0x127a   :  { %2024 = vadd.xlane.f32.xlu0 %v2023_v15  ;;  %v2866_v15 = vld [vmem:[%s3980_s15 + $0x70] sm:$0xff] }
0x127c   :  { %v3284_v18 = vpop.eup %3283 }
0x127d   :  { %v2026_v19 = vsel %vm527_vm8, %v3284_v18, 0.0 }
0x127e   :  { %2027 = vadd.xlane.f32.xlu1 %v2026_v19  ;;  %v2864_v19 = vld [vmem:[%s3980_s15 + $0x60] sm:$0xff] }
0x128f   :  { %2109 = vrot.lane.b32.xlu1 %v3751_v3, %s3334_s4  ;;  %v2843_v3 = vld [vmem:[%s3974_s9 + $0x38] sm:$0xff] }
0x1290   :  { %2033 = vrot.lane.b32.xlu0 %v3753_v26, %s3334_s4  ;;  %v2842_v26 = vld [vmem:[%s3974_s9 + $0x30] sm:$0xff] }
0x1303   :  { %v2025_v24 = vpop.xlane.xlu0 %2024 }
0x1304   :  { %3285 = vrcp.f32 %v2025_v24  ;;  %v2863_v24 = vld [vmem:[%s3980_s15 + $0x58] sm:$0xff] }
0x1307   :  { %v2028_v21 = vpop.xlane.xlu1 %2027  ;;  %v2034_v25 = vpop.permute.xlu0 %2033 }
0x1308   :  { %3287 = vrcp.f32 %v2028_v21  ;;  %3156 = vmatpush3.msra.mxu1 %v2034_v25  ;;  %v2862_v21 = vld [vmem:[%s3980_s15 + $0x50] sm:$0xff]  ;;  %v2861_v25 = vld [vmem:[%s3980_s15 + $0x48] sm:$0xff] }
0x1309   :  { %3165 = vmatprep.subr.mxu1 %v2843_v3 }
0x130b   :  { %v2110_v2 = vpop.permute.xlu1 %2109 }
0x130c   :  { %3161 = vmatpush3.msra.mxu0 %v2110_v2  ;;  %v2860_v2 = vld [vmem:[%s3980_s15 + $0x40] sm:$0xff] }
0x1311   :  { %v3286_v17 = vpop.eup %3285 }
0x1312   :  { %v2031_v27 = vmul.f32 %v3286_v17, %v3282_v20  ;;  %v2867_v20 = vld [vmem:[%s3980_s15 + $0x78] sm:$0xff]  ;;  %v2857_v17 = vld [vmem:[%s3979_s14 + $0x1] ss:$0 sm:$0xff] }
0x1314   :  { %3158 = vmatmul.mubr.msk.f32.vlgmr.msra.gmra.mxu1 %vm527_vm8, %v2031_v27 }
0x1315   :  { %v3288_v28 = vpop.eup %3287  ;;  %3166 = vmatpush3.msra.mxu1 %v2843_v3 }
0x1316   :  { %v2032_v29 = vmul.f32 %v3288_v28, %v3284_v18  ;;  %3167 = vmatprep.subr.mxu1 %v2842_v26  ;;  %v2865_v18 = vld [vmem:[%s3980_s15 + $0x68] sm:$0xff] }
0x1317   :  { %3168 = vmatpush3.msra.mxu1 %v2842_v26 }
0x1318   :  { %3163 = vmatmul.mubr.msk.f32.vlgmr.msra.gmra.mxu0 %vm527_vm8, %v2032_v29  ;;  %3169 = vmatprep.subr.mxu1 %v2841_v30 }
0x1319   :  { %3170 = vmatpush3.msra.mxu1 %v2841_v30 }
0x131a   :  { %3171 = vmatprep.subr.mxu1 %v2840_v31 }
0x131b   :  { %3172 = vmatpush3.msra.mxu1 %v2840_v31 }
0x131c   :  { %3187 = vmatprep.subr.mxu1 %v2867_v20 }
0x13d4   :  { %v2105_v32 = vpop.f32.mrf.mxu1 }
0x13d5   :  { %2187 = vrot.lane.b32.xlu1 %v2105_v32, %s3335_s7 }
0x13d6   :  { %v3159_v33 = vpop.f32.mrf.mxu1 }
0x13d8   :  { %v2181_v34 = vpop.f32.mrf.mxu0 }
0x13d9   :  { %2189 = vrot.lane.b32.xlu0 %v2181_v34, %s3335_s7 }
0x13da   :  { %v3164_v35 = vpop.f32.mrf.mxu0 }
0x1447   :  { %v2188_v36 = vpop.permute.xlu1 %2187 }
0x1448   :  { %v2193_v37 = vsel %vm375_vm6, %v3807_v57, %v2188_v36  ;;  %v2853_v57 = vld [vmem:[%s3978_s13 + $0x28] sm:$0xff] }
0x1449   :  { %3173 = vmatprep.mubr.msk.f32.mxu1 %vm200_vm4, %v2193_v37 }
0x144b   :  { %v2190_v38 = vpop.permute.xlu0 %2189 }
0x144c   :  { %v2194_v39 = vsel %vm375_vm6, %v3809_v59, %v2190_v38 }
0x144d   :  { %3174 = vmatmul.mubr.msk.f32.vlgmr.msra.gmra.mxu1 %vm200_vm4, %v2194_v39 }
0x144e   :  { %3188 = vmatpush3.msra.mxu1 %v2867_v20 }
0x144f   :  { %3189 = vmatprep.subr.mxu1 %v2866_v15 }
0x1450   :  { %3190 = vmatpush3.msra.mxu1 %v2866_v15  ;;  %v2875_v15 = vld [vmem:[%s4010_s28 + $0x1] ss:$0 sm:$0xff] }
0x1451   :  { %3191 = vmatprep.subr.mxu1 %v2865_v18 }
0x1452   :  { %3192 = vmatpush3.msra.mxu1 %v2865_v18 }
0x1453   :  { %3193 = vmatprep.subr.mxu1 %v2864_v19 }
0x1454   :  { %3194 = vmatpush3.msra.mxu1 %v2864_v19 }
0x1455   :  { %3195 = vmatprep.subr.mxu1 %v2863_v24 }
0x1456   :  { %3196 = vmatpush3.msra.mxu1 %v2863_v24 }
0x1457   :  { %3197 = vmatprep.subr.mxu1 %v2862_v21 }
0x1458   :  { %3198 = vmatpush3.msra.mxu1 %v2862_v21 }
0x1459   :  { %3199 = vmatprep.subr.mxu1 %v2861_v25 }
0x145a   :  { %3200 = vmatpush3.msra.mxu1 %v2861_v25 }
0x145b   :  { %3201 = vmatprep.subr.mxu1 %v2860_v2 }
0x145c   :  { %3202 = vmatpush3.msra.mxu1 %v2860_v2 }
0x150d   :  { %v3175_v41 = vpop.f32.mrf.mxu1 }
0x150e   :  { %v2286_v42 = vadd.f32 %v3175_v41, %v2845_v40 }
0x150f   :  { %v2280_v43 = vpop.f32.mrf.mxu1 }
0x1510   :  { %v2281_v44 = vadd.f32 %v2845_v40, %v2280_v43  ;;  %v2290_v45 = vadd.f32 %v2286_v42, %v3740_v23 }
0x1512   :  { %v2298_v46 = vsel %vm200_vm4, %v2290_v45, 0.0  ;;  %v2289_v47 = vadd.f32 %v2281_v44, %v3738_v22  ;;  %v2855_v22 = vld [vmem:[%s3978_s13 + $0x38] sm:$0xff] }
0x1513   :  { %2299 = vadd.xlane.f32.xlu0 %v2298_v46  ;;  %3176 = vmatprep.subr.mxu0 %v2855_v22 }
0x1514   :  { %v2295_v48 = vsel %vm200_vm4, %v2289_v47, 0.0  ;;  %3177 = vmatpush3.msra.mxu0 %v2855_v22 }
0x1515   :  { %2296 = vadd.xlane.f32.xlu1 %v2295_v48  ;;  %3178 = vmatprep.subr.mxu0 %v2854_v56 }
0x1516   :  { %3179 = vmatpush3.msra.mxu0 %v2854_v56 }
0x1517   :  { %3180 = vmatprep.subr.mxu0 %v2853_v57 }
0x1518   :  { %3181 = vmatpush3.msra.mxu0 %v2853_v57 }
0x1519   :  { %3182 = vmatprep.subr.mxu0 %v2852_v58 }
0x151a   :  { %3183 = vmatpush3.msra.mxu0 %v2852_v58 }
0x151b   :  { %3206 = vmatprep.subr.mxu0 %v3326_v16 }
0x159c   :  { %v2300_v49 = vpop.xlane.xlu0 %2299 }
0x159d   :  { %v2302_v50 = vmul.f32 0.03125, %v2300_v49 }
0x159e   :  { %v2297_v51 = vpop.xlane.xlu1 %2296 }
0x159f   :  { %v2304_v52 = vsub.f32 %v2290_v45, %v2302_v50  ;;  %v2301_v62 = vmul.f32 0.03125, %v2297_v51 }
0x15a1   :  { %v2303_v60 = vsub.f32 %v2289_v47, %v2301_v62  ;;  %v2306_v53 = vmul.f32 %v2304_v52, %v2304_v52  ;;  %v2869_v47 = vld [vmem:[%s3981_s16 + $0x1] ss:$0 sm:$0xff] }
0x15a3   :  { %v2310_v54 = vsel %vm200_vm4, %v2306_v53, 0.0  ;;  %v2305_v55 = vmul.f32 %v2303_v60, %v2303_v60 }
0x15a4   :  { %2311 = vadd.xlane.f32.xlu1 %v2310_v54 }
0x15a5   :  { %v2307_v23 = vsel %vm200_vm4, %v2305_v55, 0.0 }
0x15a6   :  { %2308 = vadd.xlane.f32.xlu0 %v2307_v23 }
0x162d   :  { %v2312_v59 = vpop.xlane.xlu1 %2311 }
0x162e   :  { %v2314_v61 = vmul.f32 0.03125, %v2312_v59 }
0x162f   :  { %v2309_v63 = vpop.xlane.xlu0 %2308 }
0x1630   :  { %v2316_v0 = vadd.f32 1e-12, %v2314_v61  ;;  %v2313_v1 = vmul.f32 0.03125, %v2309_v63 }
0x1632   :  { %3289 = vrsqrt.f32 %v2316_v0  ;;  %v2315_v4 = vadd.f32 1e-12, %v2313_v1  ;;  %v2598_v0 = vld [vmem:[%s3984_s19 + $0x18] sm:$0xff]  ;;  %v2597_v1 = vld [vmem:[%s3984_s19 + $0x10] sm:$0xff] }
0x1634   :  { %3291 = vrsqrt.f32 %v2315_v4  ;;  %v2596_v4 = vld [vmem:[%s3984_s19 + $0x8] sm:$0xff] }
0x163f   :  { %v3290_v5 = vpop.eup %3289 }
0x1640   :  { %v2320_v7 = vmul.f32 %v3290_v5, %v2304_v52  ;;  %v2595_v5 = vld [vmem:[%s3984_s19] sm:$0xff] }
0x1641   :  { %v3292_v8 = vpop.eup %3291 }
0x1642   :  { %v2319_v9 = vmul.f32 %v3292_v8, %v2303_v60  ;;  %v2328_v10 = vmul.f32 %v2850_v6, %v2320_v7 }
0x1644   :  { %v2327_v12 = vmul.f32 %v2850_v6, %v2319_v9  ;;  %v2336_v14 = vadd.f32 %v2851_v11, %v2328_v10 }
0x1646   :  { %v3871_v13 = vadd.f32 %v2851_v11, %v2327_v12 }
0x1648   :  { %3184 = vmatprep.mubr.msk.f32.mxu0 %vm200_vm4, %v3871_v13 }
0x1649   :  { %3185 = vmatmul.mubr.msk.f32.vlgmr.msra.gmra.mxu0 %vm200_vm4, %v2336_v14 }
0x164a   :  { %3214 = vmatprep.mubr.msk.f32.mxu0 %vm3327_vm5, %v3326_v16  ;;  %3207 = vmatpush3.msra.mxu0 %v2598_v0 }
0x164b   :  { %3208 = vmatprep.subr.mxu0 %v3326_v16 }
0x164c   :  { %3209 = vmatpush3.msra.mxu0 %v2597_v1 }
0x164d   :  { %3210 = vmatprep.subr.mxu0 %v3326_v16 }
0x164e   :  { %3211 = vmatpush3.msra.mxu0 %v2596_v4 }
0x164f   :  { %3212 = vmatprep.subr.mxu0 %v3326_v16 }
0x1650   :  { %3213 = vmatpush3.msra.mxu0 %v2595_v5 }
0x1651   :  { %3217 = vmatprep.subr.mxu0 %v3326_v16 }
0x1709   :  { %v3186_v27 = vpop.f32.mrf.mxu0 }
0x170a   :  { %v2428_v28 = vadd.f32 %v3186_v27, %v2857_v17  ;;  %v2687_v27 = vld [vmem:[%s3986_s21 + $0x18] sm:$0xff] }
0x170b   :  { %v2422_v29 = vpop.f32.mrf.mxu0 }
0x170c   :  { %v2432_v3 = vmul.f32 %v2428_v28, %v2428_v28  ;;  %v2423_v26 = vadd.f32 %v2857_v17, %v2422_v29  ;;  %v2685_v29 = vld [vmem:[%s3986_s21 + $0x8] sm:$0xff] }
0x170e   :  { %v2434_v30 = vmul.f32 %v2432_v3, %v2428_v28  ;;  %v2431_v31 = vmul.f32 %v2423_v26, %v2423_v26  ;;  %v2684_v3 = vld [vmem:[%s3986_s21] sm:$0xff] }
0x1710   :  { %v2436_v32 = vmul.f32 0.044715, %v2434_v30  ;;  %v2433_v33 = vmul.f32 %v2431_v31, %v2423_v26 }
0x1712   :  { %v2438_v34 = vadd.f32 %v2436_v32, %v2428_v28  ;;  %v2435_v35 = vmul.f32 0.044715, %v2433_v33 }
0x1714   :  { %v2440_v36 = vmul.f32 0.7978846, %v2438_v34  ;;  %v2437_v37 = vadd.f32 %v2435_v35, %v2423_v26  ;;  %v2878_v34 = vld [vmem:[%s3987_s22] ss:$0 sm:$0xff] }
0x1716   :  { %3293 = vtanh.f32 %v2440_v36  ;;  %v2439_v38 = vmul.f32 0.7978846, %v2437_v37 }
0x1718   :  { %3295 = vtanh.f32 %v2439_v38 }
0x1723   :  { %v3294_v39 = vpop.eup %3293 }
0x1724   :  { %v2444_v40 = vadd.f32 1.0, %v3294_v39 }
0x1725   :  { %v3296_v41 = vpop.eup %3295 }
0x1726   :  { %v2443_v42 = vadd.f32 1.0, %v3296_v41  ;;  %v2446_v43 = vmul.f32 0.5, %v2444_v40 }
0x1728   :  { %v2445_v44 = vmul.f32 0.5, %v2443_v42  ;;  %v2448_v46 = vmul.f32 %v2446_v43, %v2428_v28  ;;  %v2686_v28 = vld [vmem:[%s3986_s21 + $0x10] sm:$0xff]  ;;  %s3336_s21 = smov [#allocation2]  }
0x1729   :  { %s2776_s8 = sshll.u32 %s3336_s21, 4  ;;  %s2777_s8 = int_to_ptr.vmem [resolvable:$true] %s2776_s8 }
0x172a   :  { %v2447_v45 = vmul.f32 %v2445_v44, %v2423_v26  ;;  %v2876_v26 = vld [vmem:[%s3985_s20] ss:$0 sm:$0xff]  ;;  %s3303_s20 = scalar_lea.vmem %s2777_s8, 32  ;;  %p3308_p1 = scmp.lt.s32.totalorder %s2777_s8, %s2777_s8 }
0x172b   :  { %p3304_p0 = scmp.ne.s32.totalorder %s2777_s8, %s3303_s20  ;;  %p3309_p2 = scmp.lt.s32.totalorder %s3303_s20, %s3303_s20 }
0x172c   :  { %3203 = vmatprep.mubr.msk.f32.mxu1 %vm1305_vm9, %v2447_v45 }
0x172d   :  { %3204 = vmatmul.mubr.msk.f32.vlgmr.msra.gmra.mxu1 %vm1305_vm9, %v2448_v46  ;;  %p3310_p3 = por %p3309_p2, %p3308_p1 }
0x172f   :  { %p3311_p4 = pnand %p3310_p3, %p3304_p0 }
0x17ed   :  { %v3205_v48 = vpop.f32.mrf.mxu1 }
0x17ee   :  { %v2544_v49 = vadd.f32 %v3205_v48, %v2869_v47 }
0x17ef   :  { %v2538_v50 = vpop.f32.mrf.mxu1 }
0x17f0   :  { %v2539_v51 = vadd.f32 %v2869_v47, %v2538_v50  ;;  %v2548_v52 = vadd.f32 %v2544_v49, %v2336_v14 }
0x17f2   :  { %v2556_v62 = vsel %vm200_vm4, %v2548_v52, 0.0  ;;  %v2547_v60 = vadd.f32 %v2539_v51, %v3871_v13  ;;  %v2874_v13 = vld [vmem:[%s3982_s17 + $0x1] ss:$0 sm:$0xff] }
0x17f3   :  { %2557 = vadd.xlane.f32.xlu0 %v2556_v62 }
0x17f4   :  { %v2553_v53 = vsel %vm200_vm4, %v2547_v60, 0.0 }
0x17f5   :  { %2554 = vadd.xlane.f32.xlu1 %v2553_v53 }
0x187c   :  { %v2558_v54 = vpop.xlane.xlu0 %2557 }
0x187d   :  { %v2560_v55 = vmul.f32 0.03125, %v2558_v54 }
0x187e   :  { %v2555_v23 = vpop.xlane.xlu1 %2554 }
0x187f   :  { %v2562_v22 = vsub.f32 %v2548_v52, %v2560_v55  ;;  %v2559_v56 = vmul.f32 0.03125, %v2555_v23 }
0x1881   :  { %v2561_v57 = vsub.f32 %v2547_v60, %v2559_v56  ;;  %v2564_v58 = vmul.f32 %v2562_v22, %v2562_v22 }
0x1883   :  { %v2568_v59 = vsel %vm200_vm4, %v2564_v58, 0.0  ;;  %v2563_v61 = vmul.f32 %v2561_v57, %v2561_v57 }
0x1884   :  { %2569 = vadd.xlane.f32.xlu0 %v2568_v59 }
0x1885   :  { %v2565_v63 = vsel %vm200_vm4, %v2563_v61, 0.0 }
0x1886   :  { %2566 = vadd.xlane.f32.xlu1 %v2565_v63 }
0x190d   :  { %v2570_v6 = vpop.xlane.xlu0 %2569 }
0x190e   :  { %v2572_v7 = vmul.f32 0.03125, %v2570_v6 }
0x190f   :  { %v2567_v8 = vpop.xlane.xlu1 %2566 }
0x1910   :  { %v2574_v9 = vadd.f32 1e-12, %v2572_v7  ;;  %v2571_v10 = vmul.f32 0.03125, %v2567_v8 }
0x1912   :  { %3297 = vrsqrt.f32 %v2574_v9  ;;  %v2573_v11 = vadd.f32 1e-12, %v2571_v10 }
0x1914   :  { %3299 = vrsqrt.f32 %v2573_v11 }
0x191f   :  { %v3298_v12 = vpop.eup %3297 }
0x1920   :  { %v2578_v14 = vmul.f32 %v3298_v12, %v2562_v22 }
0x1921   :  { %v3300_v20 = vpop.eup %3299 }
0x1922   :  { %v2577_v18 = vmul.f32 %v3300_v20, %v2561_v57  ;;  %v2586_v19 = vmul.f32 %v2874_v13, %v2578_v14 }
0x1924   :  { %v2585_v24 = vmul.f32 %v2874_v13, %v2577_v18  ;;  %v2594_v21 = vadd.f32 %v2875_v15, %v2586_v19 }
0x1926   :  { %v2593_v25 = vadd.f32 %v2875_v15, %v2585_v24  ;;  %v2608_v2 = vrot.slane %v2594_v21, 7 }
0x1928   :  { %v2610_v17 = vsel %vm2609_vm10, %v2608_v2, %v2593_v25 }
0x1929   :  { %3215 = vmatmul.mubr.msk.f32.vlgmr.msra.gmra.mxu0 %vm200_vm4, %v2610_v17 }
0x192a   :  { %3225 = vmatprep.mubr.msk.f32.mxu0 %vm3327_vm5, %v3326_v16  ;;  %3218 = vmatpush3.msra.mxu0 %v2687_v27 }
0x192b   :  { %3219 = vmatprep.subr.mxu0 %v3326_v16 }
0x192c   :  { %3220 = vmatpush3.msra.mxu0 %v2686_v28 }
0x192d   :  { %3221 = vmatprep.subr.mxu0 %v3326_v16 }
0x192e   :  { %3222 = vmatpush3.msra.mxu0 %v2685_v29 }
0x192f   :  { %3223 = vmatprep.subr.mxu0 %v3326_v16 }
0x1930   :  { %3224 = vmatpush3.msra.mxu0 %v2684_v3 }
0x19e9   :  { %v2679_v30 = vpop.f32.mrf.mxu0 }
0x19ea   :  { %v2680_v31 = vadd.f32 %v2876_v26, %v2679_v30 }
0x19eb   :  { %v3216_v32 = vpop.f32.mrf.mxu0 }
0x19ec   :  { %3301 = vtanh.f32 %v2680_v31 }
0x19f9   :  { %v3302_v33 = vpop.eup %3301 }
0x19fa   :  { %3226 = vmatmul.mubr.msk.f32.vlgmr.msra.gmra.mxu0 %vm200_vm4, %v3302_v33 }
0x1aba   :  { %v2764_v35 = vpop.f32.mrf.mxu0 }
0x1abb   :  { %v2765_v16 = vadd.f32 %v2878_v34, %v2764_v35 }
0x1abc   :  { %v3227_v36 = vpop.f32.mrf.mxu0 }
0x1abd   :  { %2769 = vst.msk [vmem:[#allocation2] sm:$0x3] %vm2768_vm11, %v2765_v16 }
0x1abe   :  { %3314 = shalt.err (!%p3311_p4)
}
0x1abf   :  { %2779 = dma.vmem_to_hbm [thread:$0]  %s2777_s8, 32, %s3988_s23, [#allocation3]  }
0x1ac0   :  { %3323 = dma.done.wait [#allocation3], 32  }
0x1ac1   :  { %3324 = vsyncadd [#allocation3], 4294967264 }
0x1ac2   :  { %2783 = vsyncpa [#allocation3], 1 }

</bundles_post_ra>
